<compile_context>
chip_gen: v6e
topology: v6e:2x2x1
jax: 0.10.0
libtpu: 0.0.40
codegen_flags: <defaults>
</compile_context>

<pallas_src>
import jax
import jax.numpy as jnp
from jax.experimental import pallas as pl
from jax.experimental.pallas import tpu as pltpu

# ----------------------------------------------------------------------------
# Model dimensions (module: in -> 64 -> 128 -> 256 -> 128 -> 64 -> out)
# ----------------------------------------------------------------------------
INPUT_LENGTH = 32
OUTPUT_LENGTH = 8
DIMS = (INPUT_LENGTH, 64, 128, 256, 128, 64, OUTPUT_LENGTH)
# Lane-dense padded widths: every activation width is a multiple of 128 so all
# MXU passes are full-width and all stores are unmasked. Input stays 32 (K dim
# only; padding it would force an extra HBM copy of x for no gain at this size).
PADDED_DIMS = (INPUT_LENGTH, 128, 128, 256, 128, 128, 128)
PADDED_OUT = PADDED_DIMS[-1]    # real outputs = first OUTPUT_LENGTH columns
BATCH = 256                     # one full-height MXU tile on v6e/v7x


def _mlp_kernel(x_ref,
                w1_ref, b1_ref,
                w2_ref, b2_ref,
                w3_ref, b3_ref,
                w4_ref, b4_ref,
                w5_ref, b5_ref,
                w6_ref, b6_ref,
                o_ref):
    """Entire MLP forward for the (BATCH, INPUT_LENGTH) block.

    bf16 matmul operands, f32 accumulation; bias add + ReLU in f32.
    """
    h = x_ref[...].astype(jnp.bfloat16)

    def layer(h_bf16, w_ref, b_ref, relu=True):
        acc = jnp.dot(h_bf16, w_ref[...], preferred_element_type=jnp.float32)
        acc = acc + b_ref[...]
        if relu:
            acc = jnp.maximum(acc, 0.0)
        return acc

    h = layer(h, w1_ref, b1_ref).astype(jnp.bfloat16)          # (B, 128)
    h = layer(h, w2_ref, b2_ref).astype(jnp.bfloat16)          # (B, 128)
    h = layer(h, w3_ref, b3_ref).astype(jnp.bfloat16)          # (B, 256)
    h = layer(h, w4_ref, b4_ref).astype(jnp.bfloat16)          # (B, 128)
    h = layer(h, w5_ref, b5_ref).astype(jnp.bfloat16)          # (B, 128)
    out = layer(h, w6_ref, b6_ref, relu=False)                 # (B, 128) lane-dense

    o_ref[...] = out.astype(o_ref.dtype)                       # bf16 slab


def horse_rider_forward(x, params):
    """Run the HorseRider MLP forward pass with a single pallas_call.

    x: (B, INPUT_LENGTH) float32
    params: list of (w, b); w: (p_in, p_out) bf16 zero-padded to lane-dense
            widths, b: (1, p_out) f32.
    Returns: (B, OUTPUT_LENGTH) float32
    """
    B = x.shape[0]

    flat_args = [x]
    # Whole batch is one block; all index_maps are constant.
    in_specs = [pl.BlockSpec((B, INPUT_LENGTH), lambda i: (0, 0))]
    for (w, b) in params:
        flat_args.append(w)
        flat_args.append(b)
        # Constant index_map -> weights/biases DMA'd once, resident in VMEM.
        in_specs.append(pl.BlockSpec(w.shape, lambda i: (0, 0)))
        in_specs.append(pl.BlockSpec(b.shape, lambda i: (0, 0)))

    flops = 2 * B * sum(a * b for a, b in zip(PADDED_DIMS[:-1], PADDED_DIMS[1:]))
    bytes_accessed = (
        x.size * x.dtype.itemsize
        + sum(w.size * w.dtype.itemsize + b.size * b.dtype.itemsize
              for (w, b) in params)
        + B * PADDED_OUT * 2                      # bf16 output slab
    )

    out = pl.pallas_call(
        _mlp_kernel,
        out_shape=jax.ShapeDtypeStruct((B, PADDED_OUT), jnp.bfloat16),
        grid=(1,),
        in_specs=in_specs,
        out_specs=pl.BlockSpec((B, PADDED_OUT), lambda i: (0, 0)),
        compiler_params=pltpu.CompilerParams(
            dimension_semantics=("arbitrary",),
        ),
        cost_estimate=pl.CostEstimate(
            flops=flops, transcendentals=0, bytes_accessed=bytes_accessed),
    )(*flat_args)

    # Slice the 8 real columns and return f32 (matches the PyTorch module's
    # f32 output dtype).
    return out[:, :OUTPUT_LENGTH].astype(jnp.float32)


def init_params(key):
    """Deterministic init mirroring weights_init: weight ~ N(0,1), bias zeros.

    Weights are stored in (in, out) layout (y = x @ W + b, equivalent to
    PyTorch's y = x @ weight.T + bias), zero-padded to PADDED_DIMS so every
    activation is lane-dense. Zero padding keeps columns OUTPUT_LENGTH..127 of
    the result exactly zero, so slicing is lossless. Weights cast to bf16 once
    (matmul operand dtype); biases stay f32.
    """
    params = []
    for i in range(len(DIMS) - 1):
        key, wk = jax.random.split(key)
        d_in, d_out = DIMS[i], DIMS[i + 1]
        p_in, p_out = PADDED_DIMS[i], PADDED_DIMS[i + 1]
        w = jax.random.normal(wk, (d_in, d_out), dtype=jnp.float32)
        w = jnp.pad(w, ((0, p_in - d_in), (0, p_out - d_out)))
        b = jnp.zeros((1, p_out), dtype=jnp.float32)
        params.append((w.astype(jnp.bfloat16), b))
    return params


def reference_forward(x, params):
    """Pure-JAX reference with identical numerics (bf16 matmuls, f32 accum)."""
    h = x
    n = len(params)
    for i, (w, b) in enumerate(params):
        h = jnp.dot(h.astype(jnp.bfloat16), w,
                    preferred_element_type=jnp.float32) + b
        if i < n - 1:
            h = jnp.maximum(h, 0.0)
    return h[:, :OUTPUT_LENGTH]


if __name__ == "__main__":
    key = jax.random.PRNGKey(0)
    key, xk = jax.random.split(key)

    x = jax.random.normal(xk, (BATCH, INPUT_LENGTH), dtype=jnp.float32)
    params = init_params(key)

    out = horse_rider_forward(x, params)
    out = jax.block_until_ready(out)

    # sanity check against pure-JAX reference (same bf16/f32 precision recipe;
    # kernel output goes through one extra bf16 round-trip on the last layer)
    ref = reference_forward(x, params)
    assert out.shape == (BATCH, OUTPUT_LENGTH)
    rel_err = jnp.max(jnp.abs(out - ref)) / (jnp.max(jnp.abs(ref)) + 1e-6)
    assert rel_err < 2e-2, f"mismatch vs reference (rel_err={rel_err})"

    print("KERNEL_OK")
</pallas_src>

<mosaic_0001>
module attributes {stable_mosaic.version = 11 : i64} {
  func.func @_mlp_kernel(%arg0: i32, %arg1: memref<256x32xf32, #tpu.memory_space<vmem>>, %arg2: memref<32x128xbf16, #tpu.memory_space<vmem>>, %arg3: memref<1x128xf32, #tpu.memory_space<vmem>>, %arg4: memref<128x128xbf16, #tpu.memory_space<vmem>>, %arg5: memref<1x128xf32, #tpu.memory_space<vmem>>, %arg6: memref<128x256xbf16, #tpu.memory_space<vmem>>, %arg7: memref<1x256xf32, #tpu.memory_space<vmem>>, %arg8: memref<256x128xbf16, #tpu.memory_space<vmem>>, %arg9: memref<1x128xf32, #tpu.memory_space<vmem>>, %arg10: memref<128x128xbf16, #tpu.memory_space<vmem>>, %arg11: memref<1x128xf32, #tpu.memory_space<vmem>>, %arg12: memref<128x128xbf16, #tpu.memory_space<vmem>>, %arg13: memref<1x128xf32, #tpu.memory_space<vmem>>, %arg14: memref<256x128xbf16, #tpu.memory_space<vmem>>) attributes {dimension_semantics = [#tpu.dimension_semantics<arbitrary>], iteration_bounds = array<i64: 1>, scalar_prefetch = 0 : i64, scratch_operands = 0 : i64, tpu.core_type = #tpu.core_type<tc>, window_params = [{pipeline_mode = #tpu.pipeline_mode<synchronous>, transform_indices = @transform_0, window_bounds = array<i64: 256, 32>}, {pipeline_mode = #tpu.pipeline_mode<synchronous>, transform_indices = @transform_1, window_bounds = array<i64: 32, 128>}, {pipeline_mode = #tpu.pipeline_mode<synchronous>, transform_indices = @transform_2, window_bounds = array<i64: 1, 128>}, {pipeline_mode = #tpu.pipeline_mode<synchronous>, transform_indices = @transform_3, window_bounds = array<i64: 128, 128>}, {pipeline_mode = #tpu.pipeline_mode<synchronous>, transform_indices = @transform_4, window_bounds = array<i64: 1, 128>}, {pipeline_mode = #tpu.pipeline_mode<synchronous>, transform_indices = @transform_5, window_bounds = array<i64: 128, 256>}, {pipeline_mode = #tpu.pipeline_mode<synchronous>, transform_indices = @transform_6, window_bounds = array<i64: 1, 256>}, {pipeline_mode = #tpu.pipeline_mode<synchronous>, transform_indices = @transform_7, window_bounds = array<i64: 256, 128>}, {pipeline_mode = #tpu.pipeline_mode<synchronous>, transform_indices = @transform_8, window_bounds = array<i64: 1, 128>}, {pipeline_mode = #tpu.pipeline_mode<synchronous>, transform_indices = @transform_9, window_bounds = array<i64: 128, 128>}, {pipeline_mode = #tpu.pipeline_mode<synchronous>, transform_indices = @transform_10, window_bounds = array<i64: 1, 128>}, {pipeline_mode = #tpu.pipeline_mode<synchronous>, transform_indices = @transform_11, window_bounds = array<i64: 128, 128>}, {pipeline_mode = #tpu.pipeline_mode<synchronous>, transform_indices = @transform_12, window_bounds = array<i64: 1, 128>}, {pipeline_mode = #tpu.pipeline_mode<synchronous>, transform_indices = @transform_13, window_bounds = array<i64: 256, 128>}]} {
    %c0 = arith.constant 0 : index
    %c0_0 = arith.constant 0 : index
    %0 = vector.load %arg1[%c0, %c0_0] : memref<256x32xf32, #tpu.memory_space<vmem>>, vector<256x32xf32>
    %1 = arith.truncf %0 : vector<256x32xf32> to vector<256x32xbf16>
    %c0_1 = arith.constant 0 : index
    %c0_2 = arith.constant 0 : index
    %2 = vector.load %arg2[%c0_1, %c0_2] : memref<32x128xbf16, #tpu.memory_space<vmem>>, vector<32x128xbf16>
    %cst = arith.constant dense<0.000000e+00> : vector<256x128xf32>
    %3 = tpu.matmul %1, %2, %cst {dimension_numbers = #tpu.dot_dimension_numbers<[1], [0], [0], [1], [0, 0, 1, 1], [], []>} : vector<256x32xbf16>, vector<32x128xbf16>, vector<256x128xf32> -> vector<256x128xf32>
    %c0_3 = arith.constant 0 : index
    %c0_4 = arith.constant 0 : index
    %4 = vector.load %arg3[%c0_3, %c0_4] : memref<1x128xf32, #tpu.memory_space<vmem>>, vector<1x128xf32>
    %5 = vector.broadcast %4 : vector<1x128xf32> to vector<256x128xf32>
    %6 = arith.addf %3, %5 : vector<256x128xf32>
    %cst_5 = arith.constant 0.000000e+00 : f32
    %7 = vector.broadcast %cst_5 : f32 to vector<256x128xf32>
    %8 = arith.maximumf %6, %7 : vector<256x128xf32>
    %9 = arith.truncf %8 : vector<256x128xf32> to vector<256x128xbf16>
    %c0_6 = arith.constant 0 : index
    %c0_7 = arith.constant 0 : index
    %10 = vector.load %arg4[%c0_6, %c0_7] : memref<128x128xbf16, #tpu.memory_space<vmem>>, vector<128x128xbf16>
    %cst_8 = arith.constant dense<0.000000e+00> : vector<256x128xf32>
    %11 = tpu.matmul %9, %10, %cst_8 {dimension_numbers = #tpu.dot_dimension_numbers<[1], [0], [0], [1], [0, 0, 1, 1], [], []>} : vector<256x128xbf16>, vector<128x128xbf16>, vector<256x128xf32> -> vector<256x128xf32>
    %c0_9 = arith.constant 0 : index
    %c0_10 = arith.constant 0 : index
    %12 = vector.load %arg5[%c0_9, %c0_10] : memref<1x128xf32, #tpu.memory_space<vmem>>, vector<1x128xf32>
    %13 = vector.broadcast %12 : vector<1x128xf32> to vector<256x128xf32>
    %14 = arith.addf %11, %13 : vector<256x128xf32>
    %cst_11 = arith.constant 0.000000e+00 : f32
    %15 = vector.broadcast %cst_11 : f32 to vector<256x128xf32>
    %16 = arith.maximumf %14, %15 : vector<256x128xf32>
    %17 = arith.truncf %16 : vector<256x128xf32> to vector<256x128xbf16>
    %c0_12 = arith.constant 0 : index
    %c0_13 = arith.constant 0 : index
    %18 = vector.load %arg6[%c0_12, %c0_13] : memref<128x256xbf16, #tpu.memory_space<vmem>>, vector<128x256xbf16>
    %cst_14 = arith.constant dense<0.000000e+00> : vector<256x256xf32>
    %19 = tpu.matmul %17, %18, %cst_14 {dimension_numbers = #tpu.dot_dimension_numbers<[1], [0], [0], [1], [0, 0, 1, 1], [], []>} : vector<256x128xbf16>, vector<128x256xbf16>, vector<256x256xf32> -> vector<256x256xf32>
    %c0_15 = arith.constant 0 : index
    %c0_16 = arith.constant 0 : index
    %20 = vector.load %arg7[%c0_15, %c0_16] : memref<1x256xf32, #tpu.memory_space<vmem>>, vector<1x256xf32>
    %21 = vector.broadcast %20 : vector<1x256xf32> to vector<256x256xf32>
    %22 = arith.addf %19, %21 : vector<256x256xf32>
    %cst_17 = arith.constant 0.000000e+00 : f32
    %23 = vector.broadcast %cst_17 : f32 to vector<256x256xf32>
    %24 = arith.maximumf %22, %23 : vector<256x256xf32>
    %25 = arith.truncf %24 : vector<256x256xf32> to vector<256x256xbf16>
    %c0_18 = arith.constant 0 : index
    %c0_19 = arith.constant 0 : index
    %26 = vector.load %arg8[%c0_18, %c0_19] : memref<256x128xbf16, #tpu.memory_space<vmem>>, vector<256x128xbf16>
    %cst_20 = arith.constant dense<0.000000e+00> : vector<256x128xf32>
    %27 = tpu.matmul %25, %26, %cst_20 {dimension_numbers = #tpu.dot_dimension_numbers<[1], [0], [0], [1], [0, 0, 1, 1], [], []>} : vector<256x256xbf16>, vector<256x128xbf16>, vector<256x128xf32> -> vector<256x128xf32>
    %c0_21 = arith.constant 0 : index
    %c0_22 = arith.constant 0 : index
    %28 = vector.load %arg9[%c0_21, %c0_22] : memref<1x128xf32, #tpu.memory_space<vmem>>, vector<1x128xf32>
    %29 = vector.broadcast %28 : vector<1x128xf32> to vector<256x128xf32>
    %30 = arith.addf %27, %29 : vector<256x128xf32>
    %cst_23 = arith.constant 0.000000e+00 : f32
    %31 = vector.broadcast %cst_23 : f32 to vector<256x128xf32>
    %32 = arith.maximumf %30, %31 : vector<256x128xf32>
    %33 = arith.truncf %32 : vector<256x128xf32> to vector<256x128xbf16>
    %c0_24 = arith.constant 0 : index
    %c0_25 = arith.constant 0 : index
    %34 = vector.load %arg10[%c0_24, %c0_25] : memref<128x128xbf16, #tpu.memory_space<vmem>>, vector<128x128xbf16>
    %cst_26 = arith.constant dense<0.000000e+00> : vector<256x128xf32>
    %35 = tpu.matmul %33, %34, %cst_26 {dimension_numbers = #tpu.dot_dimension_numbers<[1], [0], [0], [1], [0, 0, 1, 1], [], []>} : vector<256x128xbf16>, vector<128x128xbf16>, vector<256x128xf32> -> vector<256x128xf32>
    %c0_27 = arith.constant 0 : index
    %c0_28 = arith.constant 0 : index
    %36 = vector.load %arg11[%c0_27, %c0_28] : memref<1x128xf32, #tpu.memory_space<vmem>>, vector<1x128xf32>
    %37 = vector.broadcast %36 : vector<1x128xf32> to vector<256x128xf32>
    %38 = arith.addf %35, %37 : vector<256x128xf32>
    %cst_29 = arith.constant 0.000000e+00 : f32
    %39 = vector.broadcast %cst_29 : f32 to vector<256x128xf32>
    %40 = arith.maximumf %38, %39 : vector<256x128xf32>
    %41 = arith.truncf %40 : vector<256x128xf32> to vector<256x128xbf16>
    %c0_30 = arith.constant 0 : index
    %c0_31 = arith.constant 0 : index
    %42 = vector.load %arg12[%c0_30, %c0_31] : memref<128x128xbf16, #tpu.memory_space<vmem>>, vector<128x128xbf16>
    %cst_32 = arith.constant dense<0.000000e+00> : vector<256x128xf32>
    %43 = tpu.matmul %41, %42, %cst_32 {dimension_numbers = #tpu.dot_dimension_numbers<[1], [0], [0], [1], [0, 0, 1, 1], [], []>} : vector<256x128xbf16>, vector<128x128xbf16>, vector<256x128xf32> -> vector<256x128xf32>
    %c0_33 = arith.constant 0 : index
    %c0_34 = arith.constant 0 : index
    %44 = vector.load %arg13[%c0_33, %c0_34] : memref<1x128xf32, #tpu.memory_space<vmem>>, vector<1x128xf32>
    %45 = vector.broadcast %44 : vector<1x128xf32> to vector<256x128xf32>
    %46 = arith.addf %43, %45 : vector<256x128xf32>
    %47 = arith.truncf %46 : vector<256x128xf32> to vector<256x128xbf16>
    %c0_35 = arith.constant 0 : index
    %c0_36 = arith.constant 0 : index
    %48 = vector.load %arg14[%c0_35, %c0_36] : memref<256x128xbf16, #tpu.memory_space<vmem>>, vector<256x128xbf16>
    tpu.vector_store %arg14[%c0_35, %c0_36], %47 {strides = array<i32>} : memref<256x128xbf16, #tpu.memory_space<vmem>>, vector<256x128xbf16>,
    return
  }
  func.func @transform_0(%arg0: i32) -> (i32, i32) {
    %c0_i32 = arith.constant 0 : i32
    %c0_i32_0 = arith.constant 0 : i32
    %c0_i32_1 = arith.constant 0 : i32
    return %c0_i32, %c0_i32_0 : i32, i32
  }
  func.func @transform_1(%arg0: i32) -> (i32, i32) {
    %c0_i32 = arith.constant 0 : i32
    %c0_i32_0 = arith.constant 0 : i32
    %c0_i32_1 = arith.constant 0 : i32
    return %c0_i32, %c0_i32_0 : i32, i32
  }
  func.func @transform_2(%arg0: i32) -> (i32, i32) {
    %c0_i32 = arith.constant 0 : i32
    %c0_i32_0 = arith.constant 0 : i32
    %c0_i32_1 = arith.constant 0 : i32
    return %c0_i32, %c0_i32_0 : i32, i32
  }
  func.func @transform_3(%arg0: i32) -> (i32, i32) {
    %c0_i32 = arith.constant 0 : i32
    %c0_i32_0 = arith.constant 0 : i32
    %c0_i32_1 = arith.constant 0 : i32
    return %c0_i32, %c0_i32_0 : i32, i32
  }
  func.func @transform_4(%arg0: i32) -> (i32, i32) {
    %c0_i32 = arith.constant 0 : i32
    %c0_i32_0 = arith.constant 0 : i32
    %c0_i32_1 = arith.constant 0 : i32
    return %c0_i32, %c0_i32_0 : i32, i32
  }
  func.func @transform_5(%arg0: i32) -> (i32, i32) {
    %c0_i32 = arith.constant 0 : i32
    %c0_i32_0 = arith.constant 0 : i32
    %c0_i32_1 = arith.constant 0 : i32
    return %c0_i32, %c0_i32_0 : i32, i32
  }
  func.func @transform_6(%arg0: i32) -> (i32, i32) {
    %c0_i32 = arith.constant 0 : i32
    %c0_i32_0 = arith.constant 0 : i32
    %c0_i32_1 = arith.constant 0 : i32
    return %c0_i32, %c0_i32_0 : i32, i32
  }
  func.func @transform_7(%arg0: i32) -> (i32, i32) {
    %c0_i32 = arith.constant 0 : i32
    %c0_i32_0 = arith.constant 0 : i32
    %c0_i32_1 = arith.constant 0 : i32
    return %c0_i32, %c0_i32_0 : i32, i32
  }
  func.func @transform_8(%arg0: i32) -> (i32, i32) {
    %c0_i32 = arith.constant 0 : i32
    %c0_i32_0 = arith.constant 0 : i32
    %c0_i32_1 = arith.constant 0 : i32
    return %c0_i32, %c0_i32_0 : i32, i32
  }
  func.func @transform_9(%arg0: i32) -> (i32, i32) {
    %c0_i32 = arith.constant 0 : i32
    %c0_i32_0 = arith.constant 0 : i32
    %c0_i32_1 = arith.constant 0 : i32
    return %c0_i32, %c0_i32_0 : i32, i32
  }
  func.func @transform_10(%arg0: i32) -> (i32, i32) {
    %c0_i32 = arith.constant 0 : i32
    %c0_i32_0 = arith.constant 0 : i32
    %c0_i32_1 = arith.constant 0 : i32
    return %c0_i32, %c0_i32_0 : i32, i32
  }
  func.func @transform_11(%arg0: i32) -> (i32, i32) {
    %c0_i32 = arith.constant 0 : i32
    %c0_i32_0 = arith.constant 0 : i32
    %c0_i32_1 = arith.constant 0 : i32
    return %c0_i32, %c0_i32_0 : i32, i32
  }
  func.func @transform_12(%arg0: i32) -> (i32, i32) {
    %c0_i32 = arith.constant 0 : i32
    %c0_i32_0 = arith.constant 0 : i32
    %c0_i32_1 = arith.constant 0 : i32
    return %c0_i32, %c0_i32_0 : i32, i32
  }
  func.func @transform_13(%arg0: i32) -> (i32, i32) {
    %c0_i32 = arith.constant 0 : i32
    %c0_i32_0 = arith.constant 0 : i32
    %c0_i32_1 = arith.constant 0 : i32
    return %c0_i32, %c0_i32_0 : i32, i32
  }
}

</mosaic_0001>

<bundles_post_ra>
// kernel: tpu_custom_call.1
= control target key start
LH: loop header
LB: loop body
LE: loop exit
PB: predicated region body
PF: predicated region fallthrough
CT: control target
= control target key end

     0   :  { %18 = vsyncpa [#allocation3], 0  ;;  %s3527_s0 = inlined_call_operand.vmem [shape: f32[256,32], index: 0, kind: input, shape index: {}]   ;;  %s3528_s1 = inlined_call_operand.hbm [shape: bf16[32,128], index: 1, kind: input, shape index: {}]   ;;  %s3529_s2 = inlined_call_operand.vmem [shape: f32[1,128], index: 2, kind: input, shape index: {}]   ;;  %s3530_s3 = inlined_call_operand.vmem [shape: bf16[128,128], index: 3, kind: input, shape index: {}]   ;;  %s3531_s4 = inlined_call_operand.vmem [shape: f32[1,128], index: 4, kind: input, shape index: {}]   ;;  %s3532_s5 = inlined_call_operand.vmem [shape: bf16[128,256], index: 5, kind: input, shape index: {}]   ;;  %s3533_s6 = inlined_call_operand.vmem [shape: f32[1,256], index: 6, kind: input, shape index: {}]   ;;  %s3534_s7 = inlined_call_operand.vmem [shape: bf16[256,128], index: 7, kind: input, shape index: {}]   ;;  %s3535_s8 = inlined_call_operand.vmem [shape: f32[1,128], index: 8, kind: input, shape index: {}]   ;;  %s3536_s9 = inlined_call_operand.hbm [shape: bf16[128,128], index: 9, kind: input, shape index: {}]   ;;  %s3537_s10 = inlined_call_operand.vmem [shape: f32[1,128], index: 10, kind: input, shape index: {}]   ;;  %s3538_s11 = inlined_call_operand.hbm [shape: bf16[128,128], index: 11, kind: input, shape index: {}]   ;;  %s3539_s12 = inlined_call_operand.vmem [shape: f32[1,128], index: 12, kind: input, shape index: {}]   ;;  %s3540_s13 = inlined_call_operand.hbm [shape: bf16[256,128], index: 13, kind: output, shape index: {}]  }
   0x1   :  { %19 = vsyncpa [#allocation6], 0 }
   0x2   :  { %20 = vsyncpa [#allocation4], 0  ;;  %s2922_s25 = smov [#allocation5]   ;;  %s2923_s27 = smov [#allocation2]  }
   0x3   :  { %s54_s26 = sshll.u32 %s2922_s25, 4  ;;  %s28_s28 = sshll.u32 %s2923_s27, 4  ;;  %s55_s26 = int_to_ptr.vmem [resolvable:$true] %s54_s26  ;;  %s29_s28 = int_to_ptr.vmem [resolvable:$true] %s28_s28 }
   0x4   :  { %s2844_s29 = scalar_lea.vmem %s55_s26, 1024  ;;  %p2849_p1 = scmp.lt.s32.totalorder %s55_s26, %s55_s26 }
   0x5   :  { %p2845_p0 = scmp.ne.s32.totalorder %s55_s26, %s2844_s29  ;;  %p2850_p2 = scmp.lt.s32.totalorder %s2844_s29, %s2844_s29 }
   0x7   :  { %p2851_p3 = por %p2850_p2, %p2849_p1 }
   0x9   :  { %p2852_p4 = pnand %p2851_p3, %p2845_p0 }
   0xb   :  { %2855 = shalt.err (!%p2852_p4)
}
   0xc   :  { %s2924_s30 = smov 64   ;;  %s2925_s14 = smov 4  }
   0xd   :  { %60 = dma.hbm_to_vmem [thread:$0]  %s3536_s9, 1024, %s55_s26, [#allocation6], %s2924_s30, %s2924_s30, %s2925_s14  }
   0xe   :  { %s2864_s17 = scalar_lea.vmem %s29_s28, 256  ;;  %p2869_p6 = scmp.lt.s32.totalorder %s29_s28, %s29_s28 }
   0xf   :  { %p2865_p5 = scmp.ne.s32.totalorder %s29_s28, %s2864_s17  ;;  %p2870_p7 = scmp.lt.s32.totalorder %s2864_s17, %s2864_s17 }
  0x11   :  { %p2871_p8 = por %p2870_p7, %p2869_p6 }
  0x13   :  { %p2872_p9 = pnand %p2871_p8, %p2865_p5 }
  0x15   :  { %2875 = shalt.err (!%p2872_p9)
}
  0x16   :  { %34 = dma.hbm_to_vmem [thread:$0]  %s3528_s1, 256, %s29_s28, [#allocation3], %s2924_s30, %s2924_s30, %s2925_s14  }
  0x17   :  { %s2926_s20 = smov [#allocation7]  }
  0x18   :  { %s68_s21 = sshll.u32 %s2926_s20, 4  ;;  %s69_s21 = int_to_ptr.vmem [resolvable:$true] %s68_s21 }
  0x19   :  { %s2884_s22 = scalar_lea.vmem %s69_s21, 1024  ;;  %p2889_p11 = scmp.lt.s32.totalorder %s69_s21, %s69_s21 }
  0x1a   :  { %p2885_p10 = scmp.ne.s32.totalorder %s69_s21, %s2884_s22  ;;  %p2890_p12 = scmp.lt.s32.totalorder %s2884_s22, %s2884_s22 }
  0x1c   :  { %p2891_p13 = por %p2890_p12, %p2889_p11 }
  0x1e   :  { %p2892_p0 = pnand %p2891_p13, %p2885_p10 }
  0x20   :  { %2895 = shalt.err (!%p2892_p0)
}
  0x21   :  { %74 = dma.hbm_to_vmem [thread:$0]  %s3538_s11, 1024, %s69_s21, [#allocation6], %s2924_s30, %s2924_s30, %s2925_s14  }
  0x22   :  { %2916 = dma.done.wait [#allocation3], 256  }
  0x23   :  { %2917 = vsyncadd [#allocation3], 4294967040 }
  0x24   :  { %2918 = dma.done.wait [#allocation6], 2048  }
  0x25   :  { %2919 = vsyncadd [#allocation6], 4294965248  ;;  %v2770_v0 = vld [vmem:[#allocation2 + $0x8] sm:$0xff]   ;;  %v2771_v1 = vld [vmem:[#allocation2] sm:$0xff]   ;;  %vm158_vm0 = vcmask 261120  }
  0x26   :  { %2567 = vmatprep.subr.bf16.mxu0 %v2770_v0  ;;  %v87_v2 = vld [vmem:[%s3527_s0] sm:$0xff]  ;;  %v88_v3 = vld [vmem:[%s3527_s0 + $0x8] sm:$0xff]  ;;  %v89_v5 = vld [vmem:[%s3527_s0 + $0x10] sm:$0xff] }
  0x27   :  { %2568 = vmatpush3.bf16.msra.mxu0 %v2770_v0  ;;  %v119_v4 = vpack.c.bf16 %v88_v3, %v87_v2  ;;  %v90_v6 = vld [vmem:[%s3527_s0 + $0x18] sm:$0xff]  ;;  %v91_v7 = vld [vmem:[%s3527_s0 + $0x20] sm:$0xff]  ;;  %v92_v8 = vld [vmem:[%s3527_s0 + $0x28] sm:$0xff] }
  0x28   :  { %2569 = vmatprep.subr.bf16.mxu0 %v2771_v1  ;;  %v120_v9 = vpack.c.bf16 %v90_v6, %v89_v5  ;;  %v121_v10 = vpack.c.bf16 %v92_v8, %v91_v7  ;;  %v93_v11 = vld [vmem:[%s3527_s0 + $0x30] sm:$0xff]  ;;  %v94_v12 = vld [vmem:[%s3527_s0 + $0x38] sm:$0xff]  ;;  %v95_v13 = vld [vmem:[%s3527_s0 + $0x40] sm:$0xff] }
  0x29   :  { %2571 = vmatprep.mubr.msk.bf16.mxu0 %vm158_vm0, %v119_v4  ;;  %v96_v14 = vld [vmem:[%s3527_s0 + $0x48] sm:$0xff]  ;;  %v2772_v15 = vld [vmem:[%s3530_s3 + $0x38] sm:$0xff]   ;;  %v122_v16 = vpack.c.bf16 %v94_v12, %v93_v11  ;;  %v2773_v17 = vld [vmem:[%s3530_s3 + $0x30] sm:$0xff]  }
  0x2a   :  { %v123_v18 = vpack.c.bf16 %v96_v14, %v95_v13  ;;  %2603 = vmatprep.subr.bf16.mxu1 %v2772_v15  ;;  %v97_v19 = vld [vmem:[%s3527_s0 + $0x50] sm:$0xff]  ;;  %v98_v20 = vld [vmem:[%s3527_s0 + $0x58] sm:$0xff]  ;;  %v2774_v21 = vld [vmem:[%s3530_s3 + $0x28] sm:$0xff]  }
  0x2b   :  { %2570 = vmatpush3.bf16.msra.mxu0 %v2771_v1  ;;  %2604 = vmatpush3.bf16.msra.mxu1 %v2772_v15  ;;  %v99_v22 = vld [vmem:[%s3527_s0 + $0x60] sm:$0xff]  ;;  %v100_v23 = vld [vmem:[%s3527_s0 + $0x68] sm:$0xff]  ;;  %v124_v25 = vpack.c.bf16 %v98_v20, %v97_v19  ;;  %v2776_v27 = vld [vmem:[%s3530_s3 + $0x18] sm:$0xff]  }
  0x2c   :  { %2605 = vmatprep.subr.bf16.mxu1 %v2773_v17  ;;  %v2775_v24 = vld [vmem:[%s3530_s3 + $0x20] sm:$0xff]   ;;  %v125_v26 = vpack.c.bf16 %v100_v23, %v99_v22  ;;  %v101_v28 = vld [vmem:[%s3527_s0 + $0x70] sm:$0xff]  ;;  %v102_v29 = vld [vmem:[%s3527_s0 + $0x78] sm:$0xff] }
  0x2d   :  { %v103_v30 = vld [vmem:[%s3527_s0 + $0x80] sm:$0xff]  ;;  %v104_v31 = vld [vmem:[%s3527_s0 + $0x88] sm:$0xff]  ;;  %v126_v32 = vpack.c.bf16 %v102_v29, %v101_v28  ;;  %v105_v34 = vld [vmem:[%s3527_s0 + $0x90] sm:$0xff] }
  0x2e   :  { %2572 = vmatmul.mubr.msk.bf16.vlgmr.msra.gmra.mxu0 %vm158_vm0, %v120_v9  ;;  %v127_v33 = vpack.c.bf16 %v104_v31, %v103_v30  ;;  %v106_v35 = vld [vmem:[%s3527_s0 + $0x98] sm:$0xff]  ;;  %v107_v36 = vld [vmem:[%s3527_s0 + $0xa0] sm:$0xff]  ;;  %v108_v37 = vld [vmem:[%s3527_s0 + $0xa8] sm:$0xff] }
  0x2f   :  { %2575 = vmatprep.mubr.msk.bf16.mxu0 %vm158_vm0, %v121_v10  ;;  %2606 = vmatpush3.bf16.msra.mxu1 %v2773_v17  ;;  %v128_v38 = vpack.c.bf16 %v106_v35, %v105_v34  ;;  %v129_v39 = vpack.c.bf16 %v108_v37, %v107_v36  ;;  %v109_v40 = vld [vmem:[%s3527_s0 + $0xb0] sm:$0xff]  ;;  %v110_v41 = vld [vmem:[%s3527_s0 + $0xb8] sm:$0xff]  ;;  %v111_v42 = vld [vmem:[%s3527_s0 + $0xc0] sm:$0xff] }
  0x30   :  { %2607 = vmatprep.subr.bf16.mxu1 %v2774_v21  ;;  %v112_v43 = vld [vmem:[%s3527_s0 + $0xc8] sm:$0xff]  ;;  %v130_v44 = vpack.c.bf16 %v110_v41, %v109_v40  ;;  %v113_v46 = vld [vmem:[%s3527_s0 + $0xd0] sm:$0xff]  ;;  %v114_v47 = vld [vmem:[%s3527_s0 + $0xd8] sm:$0xff] }
  0x31   :  { %v131_v45 = vpack.c.bf16 %v112_v43, %v111_v42  ;;  %v115_v48 = vld [vmem:[%s3527_s0 + $0xe0] sm:$0xff]  ;;  %v116_v49 = vld [vmem:[%s3527_s0 + $0xe8] sm:$0xff]  ;;  %v132_v50 = vpack.c.bf16 %v114_v47, %v113_v46  ;;  %v117_v52 = vld [vmem:[%s3527_s0 + $0xf0] sm:$0xff] }
  0x32   :  { %v133_v51 = vpack.c.bf16 %v116_v49, %v115_v48  ;;  %v118_v53 = vld [vmem:[%s3527_s0 + $0xf8] sm:$0xff]  ;;  %v2777_v55 = vld [vmem:[%s3530_s3 + $0x10] sm:$0xff]   ;;  %v2778_v56 = vld [vmem:[%s3530_s3 + $0x8] sm:$0xff]  }
  0x33   :  { %2608 = vmatpush3.bf16.msra.mxu1 %v2774_v21  ;;  %v134_v54 = vpack.c.bf16 %v118_v53, %v117_v52  ;;  %v2779_v57 = vld [vmem:[%s3530_s3] sm:$0xff]   ;;  %v2780_v58 = vld [vmem:[%s3532_s5 + $0x70] ss:$8 sps:$4 sm:$0xff]   ;;  %v2782_v59 = vld [vmem:[%s3532_s5 + $0x74] ss:$8 sps:$4 sm:$0xff]  }
  0x34   :  { %2609 = vmatprep.subr.bf16.mxu1 %v2775_v24  ;;  %v2785_v60 = vld [vmem:[%s3532_s5 + $0x64] ss:$8 sps:$4 sm:$0xff]   ;;  %804 = vmatprep.subr.bf16.mxu0 %v2782_v59  ;;  %v2783_v61 = vld [vmem:[%s3532_s5 + $0x60] ss:$8 sps:$4 sm:$0xff]   ;;  %v2788_v62 = vld [vmem:[%s3532_s5 + $0x54] ss:$8 sps:$4 sm:$0xff]  }
  0x35   :  { %805 = vmatpush1.bf16.msra.mxu0 %v2780_v58  ;;  %v2786_v63 = vld [vmem:[%s3532_s5 + $0x50] ss:$8 sps:$4 sm:$0xff]   ;;  %v2791_v0 = vld [vmem:[%s3532_s5 + $0x44] ss:$8 sps:$4 sm:$0xff]   ;;  %v2789_v1 = vld [vmem:[%s3532_s5 + $0x40] ss:$8 sps:$4 sm:$0xff]  }
  0x36   :  { %2576 = vmatmul.mubr.msk.bf16.gmra.mxu0 %vm158_vm0, %v122_v16  ;;  %806 = vmatprep.subr.bf16.mxu0 %v2785_v60  ;;  %v2794_v2 = vld [vmem:[%s3532_s5 + $0x34] ss:$8 sps:$4 sm:$0xff]   ;;  %v2792_v3 = vld [vmem:[%s3532_s5 + $0x30] ss:$8 sps:$4 sm:$0xff]   ;;  %v2797_v4 = vld [vmem:[%s3532_s5 + $0x24] ss:$8 sps:$4 sm:$0xff]  }
  0x37   :  { %2579 = vmatprep.mubr.msk.bf16.mxu0 %vm158_vm0, %v123_v18  ;;  %2610 = vmatpush3.bf16.msra.mxu1 %v2775_v24  ;;  %v2795_v5 = vld [vmem:[%s3532_s5 + $0x20] ss:$8 sps:$4 sm:$0xff]   ;;  %v2800_v6 = vld [vmem:[%s3532_s5 + $0x14] ss:$8 sps:$4 sm:$0xff]   ;;  %v2798_v7 = vld [vmem:[%s3532_s5 + $0x10] ss:$8 sps:$4 sm:$0xff]  }
  0x38   :  { %2611 = vmatprep.subr.bf16.mxu1 %v2776_v27  ;;  %v3198_v10 = vld [vmem:[%s3529_s2] ss:$0 sm:$0xff] }
  0x39   :  { %807 = vmatpush1.bf16.msra.mxu0 %v2783_v61 }
  0x3a   :  { %808 = vmatprep.subr.bf16.mxu0 %v2788_v62 }
  0x3b   :  { %2612 = vmatpush3.bf16.msra.mxu1 %v2776_v27 }
  0x3c   :  { %2613 = vmatprep.subr.bf16.mxu1 %v2777_v55 }
  0x3d   :  { %809 = vmatpush1.bf16.msra.mxu0 %v2786_v63 }
  0x3e   :  { %2580 = vmatmul.mubr.msk.bf16.gmra.mxu0 %vm158_vm0, %v124_v25  ;;  %810 = vmatprep.subr.bf16.mxu0 %v2791_v0 }
  0x3f   :  { %2583 = vmatprep.mubr.msk.bf16.mxu0 %vm158_vm0, %v125_v26  ;;  %2614 = vmatpush3.bf16.msra.mxu1 %v2777_v55 }
  0x40   :  { %2615 = vmatprep.subr.bf16.mxu1 %v2778_v56 }
  0x41   :  { %811 = vmatpush1.bf16.msra.mxu0 %v2789_v1 }
  0x42   :  { %812 = vmatprep.subr.bf16.mxu0 %v2794_v2 }
  0x43   :  { %2616 = vmatpush3.bf16.msra.mxu1 %v2778_v56 }
  0x44   :  { %2617 = vmatprep.subr.bf16.mxu1 %v2779_v57 }
  0x45   :  { %813 = vmatpush1.bf16.msra.mxu0 %v2792_v3 }
  0x46   :  { %2584 = vmatmul.mubr.msk.bf16.gmra.mxu0 %vm158_vm0, %v126_v32  ;;  %814 = vmatprep.subr.bf16.mxu0 %v2797_v4 }
  0x47   :  { %2587 = vmatprep.mubr.msk.bf16.mxu0 %vm158_vm0, %v127_v33  ;;  %2618 = vmatpush3.bf16.msra.mxu1 %v2779_v57 }
  0x49   :  { %815 = vmatpush1.bf16.msra.mxu0 %v2795_v5 }
  0x4a   :  { %816 = vmatprep.subr.bf16.mxu0 %v2800_v6 }
  0x4d   :  { %817 = vmatpush1.bf16.msra.mxu0 %v2798_v7 }
  0x4e   :  { %2588 = vmatmul.mubr.msk.bf16.gmra.mxu0 %vm158_vm0, %v128_v38 }
  0x4f   :  { %2591 = vmatprep.mubr.msk.bf16.mxu0 %vm158_vm0, %v129_v39 }
  0x56   :  { %2592 = vmatmul.mubr.msk.bf16.gmra.mxu0 %vm158_vm0, %v130_v44 }
  0x57   :  { %2595 = vmatprep.mubr.msk.bf16.mxu0 %vm158_vm0, %v131_v45 }
  0x5e   :  { %2596 = vmatmul.mubr.msk.bf16.gmra.mxu0 %vm158_vm0, %v132_v50 }
  0x5f   :  { %2599 = vmatprep.mubr.msk.bf16.mxu0 %vm158_vm0, %v133_v51 }
  0x66   :  { %2600 = vmatmul.mubr.msk.bf16.gmra.mxu0 %vm158_vm0, %v134_v54 }
  0xee   :  { %v2573_v8 = vpop.f32.mrf.mxu0 }
  0xef   :  { %v250_v14 = vadd.f32 %v2573_v8, %v3198_v10 }
  0xf0   :  { %v241_v9 = vpop.f32.mrf.mxu0 }
  0xf1   :  { %v242_v12 = vadd.f32 %v3198_v10, %v241_v9  ;;  %v370_v21 = vmax.f32 %v250_v14, 0.0 }
  0xf2   :  { %v2574_v11 = vpop.f32.mrf.mxu0 }
  0xf3   :  { %v253_v13 = vadd.f32 %v2574_v11, %v3198_v10  ;;  %v368_v19 = vmax.f32 %v242_v12, 0.0 }
  0xf4   :  { %v244_v15 = vpop.f32.mrf.mxu0 }
  0xf5   :  { %v245_v16 = vadd.f32 %v3198_v10, %v244_v15  ;;  %v371_v17 = vmax.f32 %v253_v13, 0.0 }
  0xf6   :  { %v2577_v18 = vpop.f32.mrf.mxu0 }
  0xf7   :  { %v369_v20 = vmax.f32 %v245_v16, 0.0  ;;  %v266_v22 = vadd.f32 %v2577_v18, %v3198_v10  ;;  %v401_v26 = vpack.c.bf16 %v371_v17, %v370_v21 }
  0xf8   :  { %v257_v23 = vpop.f32.mrf.mxu0 }
  0xf9   :  { %v258_v24 = vadd.f32 %v3198_v10, %v257_v23  ;;  %v400_v25 = vpack.c.bf16 %v369_v20, %v368_v19  ;;  %v374_v29 = vmax.f32 %v266_v22, 0.0 }
  0xfa   :  { %v2578_v27 = vpop.f32.mrf.mxu0 }
  0xfb   :  { %v269_v28 = vadd.f32 %v2578_v27, %v3198_v10  ;;  %2619 = vmatprep.mubr.bf16.mxu1 %v400_v25  ;;  %v372_v31 = vmax.f32 %v258_v24, 0.0 }
  0xfc   :  { %v260_v30 = vpop.f32.mrf.mxu0  ;;  %2620 = vmatmul.mubr.bf16.vlgmr.msra.gmra.mxu1 %v401_v26 }
  0xfd   :  { %v375_v32 = vmax.f32 %v269_v28, 0.0  ;;  %v261_v33 = vadd.f32 %v3198_v10, %v260_v30 }
  0xfe   :  { %v2581_v34 = vpop.f32.mrf.mxu0 }
  0xff   :  { %v373_v35 = vmax.f32 %v261_v33, 0.0  ;;  %v403_v36 = vpack.c.bf16 %v375_v32, %v374_v29  ;;  %v282_v37 = vadd.f32 %v2581_v34, %v3198_v10 }
 0x100   :  { %v273_v38 = vpop.f32.mrf.mxu0 }
 0x101   :  { %v274_v39 = vadd.f32 %v3198_v10, %v273_v38  ;;  %v402_v40 = vpack.c.bf16 %v373_v35, %v372_v31  ;;  %v378_v43 = vmax.f32 %v282_v37, 0.0 }
 0x102   :  { %v2582_v41 = vpop.f32.mrf.mxu0 }
 0x103   :  { %2623 = vmatprep.mubr.bf16.mxu1 %v402_v40  ;;  %v285_v42 = vadd.f32 %v2582_v41, %v3198_v10  ;;  %v376_v45 = vmax.f32 %v274_v39, 0.0 }
 0x104   :  { %2624 = vmatmul.mubr.bf16.gmra.mxu1 %v403_v36  ;;  %v276_v44 = vpop.f32.mrf.mxu0 }
 0x105   :  { %v379_v46 = vmax.f32 %v285_v42, 0.0  ;;  %v277_v47 = vadd.f32 %v3198_v10, %v276_v44 }
 0x106   :  { %v2585_v48 = vpop.f32.mrf.mxu0 }
 0x107   :  { %v377_v49 = vmax.f32 %v277_v47, 0.0  ;;  %v405_v50 = vpack.c.bf16 %v379_v46, %v378_v43  ;;  %v298_v51 = vadd.f32 %v2585_v48, %v3198_v10 }
 0x108   :  { %v289_v52 = vpop.f32.mrf.mxu0 }
 0x109   :  { %v404_v53 = vpack.c.bf16 %v377_v49, %v376_v45  ;;  %v290_v54 = vadd.f32 %v3198_v10, %v289_v52  ;;  %v382_v57 = vmax.f32 %v298_v51, 0.0 }
 0x10a   :  { %v2586_v55 = vpop.f32.mrf.mxu0 }
 0x10b   :  { %2627 = vmatprep.mubr.bf16.mxu1 %v404_v53  ;;  %v301_v56 = vadd.f32 %v2586_v55, %v3198_v10  ;;  %v380_v59 = vmax.f32 %v290_v54, 0.0 }
 0x10c   :  { %2628 = vmatmul.mubr.bf16.gmra.mxu1 %v405_v50  ;;  %v292_v58 = vpop.f32.mrf.mxu0 }
 0x10d   :  { %v383_v60 = vmax.f32 %v301_v56, 0.0  ;;  %v293_v61 = vadd.f32 %v3198_v10, %v292_v58  ;;  %v2803_v58 = vld [vmem:[%s3532_s5 + $0x4] ss:$8 sps:$4 sm:$0xff]  }
 0x10e   :  { %v2589_v62 = vpop.f32.mrf.mxu0  ;;  %818 = vmatprep.subr.bf16.mxu0 %v2803_v58 }
 0x10f   :  { %v381_v63 = vmax.f32 %v293_v61, 0.0  ;;  %v407_v0 = vpack.c.bf16 %v383_v60, %v382_v57  ;;  %v314_v1 = vadd.f32 %v2589_v62, %v3198_v10  ;;  %v2927_v60 = vmov 0   ;;  %v3242_v62 = vld [vmem:[%s3531_s4] ss:$0 sm:$0xff] }
 0x110   :  { %v305_v2 = vpop.f32.mrf.mxu0  ;;  %836 = vmatprep.mubr.bf16.mxu0 %v2927_v60 }
 0x111   :  { %v406_v3 = vpack.c.bf16 %v381_v63, %v380_v59  ;;  %v306_v4 = vadd.f32 %v3198_v10, %v305_v2  ;;  %v386_v7 = vmax.f32 %v314_v1, 0.0  ;;  %v2801_v59 = vld [vmem:[%s3532_s5] ss:$8 sps:$4 sm:$0xff]   ;;  %v2804_v1 = vld [vmem:[%s3534_s7 + $0x78] sm:$0xff]  }
 0x112   :  { %v2590_v5 = vpop.f32.mrf.mxu0  ;;  %819 = vmatpush1.bf16.msra.mxu0 %v2801_v59  ;;  %v2805_v2 = vld [vmem:[%s3534_s7 + $0x38] sm:$0xff]   ;;  %2407 = vmatprep.subr.bf16.mxu1 %v2804_v1 }
 0x113   :  { %2631 = vmatprep.mubr.bf16.mxu1 %v406_v3  ;;  %v317_v6 = vadd.f32 %v2590_v5, %v3198_v10  ;;  %v384_v9 = vmax.f32 %v306_v4, 0.0  ;;  %v2806_v3 = vld [vmem:[%s3534_s7 + $0x70] sm:$0xff]   ;;  %2408 = vmatpush3.bf16.msra.mxu1 %v2805_v2 }
 0x114   :  { %2632 = vmatmul.mubr.bf16.gmra.mxu1 %v407_v0  ;;  %v308_v8 = vpop.f32.mrf.mxu0  ;;  %2409 = vmatprep.subr.bf16.mxu1 %v2806_v3 }
 0x115   :  { %v387_v11 = vmax.f32 %v317_v6, 0.0  ;;  %v309_v12 = vadd.f32 %v3198_v10, %v308_v8 }
 0x116   :  { %v2593_v13 = vpop.f32.mrf.mxu0 }
 0x117   :  { %v385_v14 = vmax.f32 %v309_v12, 0.0  ;;  %v409_v15 = vpack.c.bf16 %v387_v11, %v386_v7  ;;  %v330_v16 = vadd.f32 %v2593_v13, %v3198_v10  ;;  %v2807_v7 = vld [vmem:[%s3534_s7 + $0x30] sm:$0xff]   ;;  %v2808_v11 = vld [vmem:[%s3534_s7 + $0x68] sm:$0xff]  }
 0x118   :  { %v321_v17 = vpop.f32.mrf.mxu0  ;;  %2410 = vmatpush3.bf16.msra.mxu1 %v2807_v7 }
 0x119   :  { %v408_v18 = vpack.c.bf16 %v385_v14, %v384_v9  ;;  %v322_v19 = vadd.f32 %v3198_v10, %v321_v17  ;;  %v390_v22 = vmax.f32 %v330_v16, 0.0  ;;  %v2809_v16 = vld [vmem:[%s3534_s7 + $0x28] sm:$0xff]   ;;  %2411 = vmatprep.subr.bf16.mxu1 %v2808_v11 }
 0x11a   :  { %v2594_v20 = vpop.f32.mrf.mxu0 }
 0x11b   :  { %2635 = vmatprep.mubr.bf16.mxu1 %v408_v18  ;;  %v333_v21 = vadd.f32 %v2594_v20, %v3198_v10  ;;  %v388_v24 = vmax.f32 %v322_v19, 0.0  ;;  %v2810_v18 = vld [vmem:[%s3534_s7 + $0x60] sm:$0xff]  }
 0x11c   :  { %2636 = vmatmul.mubr.bf16.gmra.mxu1 %v409_v15  ;;  %v324_v23 = vpop.f32.mrf.mxu0 }
 0x11d   :  { %v391_v25 = vmax.f32 %v333_v21, 0.0  ;;  %v325_v26 = vadd.f32 %v3198_v10, %v324_v23  ;;  %2412 = vmatpush3.bf16.msra.mxu1 %v2809_v16  ;;  %v2811_v21 = vld [vmem:[%s3534_s7 + $0x20] sm:$0xff]   ;;  %v2812_v23 = vld [vmem:[%s3534_s7 + $0x58] sm:$0xff]  }
 0x11e   :  { %v2597_v27 = vpop.f32.mrf.mxu0  ;;  %2413 = vmatprep.subr.bf16.mxu1 %v2810_v18 }
 0x11f   :  { %v389_v28 = vmax.f32 %v325_v26, 0.0  ;;  %v411_v29 = vpack.c.bf16 %v391_v25, %v390_v22  ;;  %v346_v30 = vadd.f32 %v2597_v27, %v3198_v10  ;;  %v2813_v27 = vld [vmem:[%s3534_s7 + $0x18] sm:$0xff]  }
 0x120   :  { %v337_v31 = vpop.f32.mrf.mxu0 }
 0x121   :  { %v410_v32 = vpack.c.bf16 %v389_v28, %v388_v24  ;;  %v338_v33 = vadd.f32 %v3198_v10, %v337_v31  ;;  %v394_v36 = vmax.f32 %v346_v30, 0.0  ;;  %2414 = vmatpush3.bf16.msra.mxu1 %v2811_v21 }
 0x122   :  { %v2598_v34 = vpop.f32.mrf.mxu0  ;;  %2415 = vmatprep.subr.bf16.mxu1 %v2812_v23 }
 0x123   :  { %2639 = vmatprep.mubr.bf16.mxu1 %v410_v32  ;;  %v349_v35 = vadd.f32 %v2598_v34, %v3198_v10  ;;  %v392_v38 = vmax.f32 %v338_v33, 0.0  ;;  %v2815_v32 = vld [vmem:[%s3534_s7 + $0x10] sm:$0xff]   ;;  %v2816_v34 = vld [vmem:[%s3534_s7 + $0x48] sm:$0xff]  }
 0x124   :  { %2640 = vmatmul.mubr.bf16.gmra.mxu1 %v411_v29  ;;  %v340_v37 = vpop.f32.mrf.mxu0  ;;  %v2814_v29 = vld [vmem:[%s3534_s7 + $0x50] sm:$0xff]  }
 0x125   :  { %v395_v39 = vmax.f32 %v349_v35, 0.0  ;;  %v341_v40 = vadd.f32 %v3198_v10, %v340_v37  ;;  %2416 = vmatpush3.bf16.msra.mxu1 %v2813_v27  ;;  %v2818_v27 = vld [vmem:[%s3534_s7 + $0x40] sm:$0xff]  }
 0x126   :  { %v2601_v41 = vpop.f32.mrf.mxu0  ;;  %2417 = vmatprep.subr.bf16.mxu1 %v2814_v29 }
 0x127   :  { %v393_v42 = vmax.f32 %v341_v40, 0.0  ;;  %v413_v43 = vpack.c.bf16 %v395_v39, %v394_v36  ;;  %v362_v44 = vadd.f32 %v2601_v41, %v3198_v10 }
 0x128   :  { %v353_v45 = vpop.f32.mrf.mxu0 }
 0x129   :  { %v412_v46 = vpack.c.bf16 %v393_v42, %v392_v38  ;;  %v354_v47 = vadd.f32 %v3198_v10, %v353_v45  ;;  %v398_v50 = vmax.f32 %v362_v44, 0.0  ;;  %2418 = vmatpush3.bf16.msra.mxu1 %v2815_v32  ;;  %v2817_v38 = vld [vmem:[%s3534_s7 + $0x8] sm:$0xff]  }
 0x12a   :  { %v2602_v48 = vpop.f32.mrf.mxu0  ;;  %2419 = vmatprep.subr.bf16.mxu1 %v2816_v34 }
 0x12b   :  { %2643 = vmatprep.mubr.bf16.mxu1 %v412_v46  ;;  %v365_v49 = vadd.f32 %v2602_v48, %v3198_v10  ;;  %v396_v52 = vmax.f32 %v354_v47, 0.0 }
 0x12c   :  { %2644 = vmatmul.mubr.bf16.gmra.mxu1 %v413_v43  ;;  %v356_v51 = vpop.f32.mrf.mxu0 }
 0x12d   :  { %v399_v53 = vmax.f32 %v365_v49, 0.0  ;;  %v357_v54 = vadd.f32 %v3198_v10, %v356_v51  ;;  %2420 = vmatpush3.bf16.msra.mxu1 %v2817_v38 }
 0x12e   :  { %2421 = vmatprep.subr.bf16.mxu1 %v2818_v27 }
 0x12f   :  { %v397_v55 = vmax.f32 %v357_v54, 0.0  ;;  %v415_v56 = vpack.c.bf16 %v399_v53, %v398_v50 }
 0x131   :  { %v414_v57 = vpack.c.bf16 %v397_v55, %v396_v52 }
 0x133   :  { %2647 = vmatprep.mubr.bf16.mxu1 %v414_v57 }
 0x134   :  { %2648 = vmatmul.mubr.bf16.gmra.mxu1 %v415_v56 }
 0x1bc   :  { %v2621_v61 = vpop.f32.mrf.mxu1 }
 0x1bd   :  { %v530_v17 = vadd.f32 %v2621_v61, %v3242_v62 }
 0x1be   :  { %v521_v10 = vpop.f32.mrf.mxu1 }
 0x1bf   :  { %v522_v0 = vadd.f32 %v3242_v62, %v521_v10  ;;  %v650_v22 = vmax.f32 %v530_v17, 0.0 }
 0x1c0   :  { %v2622_v63 = vpop.f32.mrf.mxu1 }
 0x1c1   :  { %v648_v8 = vmax.f32 %v522_v0, 0.0  ;;  %v533_v13 = vadd.f32 %v2622_v63, %v3242_v62 }
 0x1c2   :  { %v524_v4 = vpop.f32.mrf.mxu1 }
 0x1c3   :  { %v525_v5 = vadd.f32 %v3242_v62, %v524_v4  ;;  %v651_v19 = vmax.f32 %v533_v13, 0.0 }
 0x1c4   :  { %v2625_v6 = vpop.f32.mrf.mxu1 }
 0x1c5   :  { %v649_v9 = vmax.f32 %v525_v5, 0.0  ;;  %v681_v24 = vpack.c.bf16 %v651_v19, %v650_v22  ;;  %v546_v39 = vadd.f32 %v2625_v6, %v3242_v62 }
 0x1c6   :  { %v537_v12 = vpop.f32.mrf.mxu1 }
 0x1c7   :  { %v680_v14 = vpack.c.bf16 %v649_v9, %v648_v8  ;;  %v538_v28 = vadd.f32 %v3242_v62, %v537_v12  ;;  %v654_v42 = vmax.f32 %v546_v39, 0.0 }
 0x1c8   :  { %v2626_v15 = vpop.f32.mrf.mxu1 }
 0x1c9   :  { %837 = vmatmul.mubr.bf16.vlgmr.msra.gmra.mxu0 %v680_v14  ;;  %v652_v33 = vmax.f32 %v538_v28, 0.0  ;;  %v549_v35 = vadd.f32 %v2626_v15, %v3242_v62  ;;  %v2819_v28 = vld [vmem:[%s3534_s7] sm:$0xff]  }
 0x1ca   :  { %846 = vmatprep.mubr.bf16.mxu0 %v2927_v60  ;;  %v540_v20 = vpop.f32.mrf.mxu1  ;;  %2422 = vmatpush3.bf16.msra.mxu1 %v2819_v28 }
 0x1cb   :  { %v541_v25 = vadd.f32 %v3242_v62, %v540_v20  ;;  %v655_v40 = vmax.f32 %v549_v35, 0.0 }
 0x1cc   :  { %v2629_v26 = vpop.f32.mrf.mxu1 }
 0x1cd   :  { %v653_v30 = vmax.f32 %v541_v25, 0.0  ;;  %v683_v43 = vpack.c.bf16 %v655_v40, %v654_v42  ;;  %v562_v50 = vadd.f32 %v2629_v26, %v3242_v62 }
 0x1ce   :  { %v553_v31 = vpop.f32.mrf.mxu1 }
 0x1cf   :  { %v682_v36 = vpack.c.bf16 %v653_v30, %v652_v33  ;;  %v554_v44 = vadd.f32 %v3242_v62, %v553_v31  ;;  %v658_v54 = vmax.f32 %v562_v50, 0.0 }
 0x1d0   :  { %v2630_v37 = vpop.f32.mrf.mxu1 }
 0x1d1   :  { %847 = vmatmul.mubr.bf16.gmra.mxu0 %v681_v24  ;;  %v656_v47 = vmax.f32 %v554_v44, 0.0  ;;  %v565_v51 = vadd.f32 %v2630_v37, %v3242_v62 }
 0x1d2   :  { %856 = vmatprep.mubr.bf16.mxu0 %v2927_v60  ;;  %v556_v41 = vpop.f32.mrf.mxu1 }
 0x1d3   :  { %v557_v45 = vadd.f32 %v3242_v62, %v556_v41  ;;  %v659_v55 = vmax.f32 %v565_v51, 0.0 }
 0x1d4   :  { %v2633_v46 = vpop.f32.mrf.mxu1 }
 0x1d5   :  { %v657_v48 = vmax.f32 %v557_v45, 0.0  ;;  %v685_v57 = vpack.c.bf16 %v659_v55, %v658_v54  ;;  %v578_v1 = vadd.f32 %v2633_v46, %v3242_v62 }
 0x1d6   :  { %v569_v49 = vpop.f32.mrf.mxu1 }
 0x1d7   :  { %v684_v52 = vpack.c.bf16 %v657_v48, %v656_v47  ;;  %v570_v58 = vadd.f32 %v3242_v62, %v569_v49  ;;  %v662_v5 = vmax.f32 %v578_v1, 0.0  ;;  %v714_v1 = vlaneseq }
 0x1d8   :  { %v2634_v53 = vpop.f32.mrf.mxu1 }
 0x1d9   :  { %857 = vmatmul.mubr.bf16.gmra.mxu0 %v682_v36  ;;  %v660_v10 = vmax.f32 %v570_v58, 0.0  ;;  %v581_v2 = vadd.f32 %v2634_v53, %v3242_v62 }
 0x1da   :  { %866 = vmatprep.mubr.bf16.mxu0 %v2927_v60  ;;  %v572_v56 = vpop.f32.mrf.mxu1 }
 0x1db   :  { %v573_v59 = vadd.f32 %v3242_v62, %v572_v56  ;;  %v663_v6 = vmax.f32 %v581_v2, 0.0  ;;  %v715_v2 = vshrl.u32 %v714_v1, 7 }
 0x1dc   :  { %v2637_v61 = vpop.f32.mrf.mxu1 }
 0x1dd   :  { %v661_v63 = vmax.f32 %v573_v59, 0.0  ;;  %v687_v8 = vpack.c.bf16 %v663_v6, %v662_v5  ;;  %v594_v16 = vadd.f32 %v2637_v61, %v3242_v62  ;;  %v712_v5 = vld [vmem:[%s3533_s6] sm:$0x3] }
 0x1de   :  { %v585_v0 = vpop.f32.mrf.mxu1 }
 0x1df   :  { %v686_v3 = vpack.c.bf16 %v661_v63, %v660_v10  ;;  %v586_v9 = vadd.f32 %v3242_v62, %v585_v0  ;;  %v666_v20 = vmax.f32 %v594_v16, 0.0 }
 0x1e0   :  { %v2638_v4 = vpop.f32.mrf.mxu1 }
 0x1e1   :  { %867 = vmatmul.mubr.bf16.gmra.mxu0 %v683_v43  ;;  %v664_v13 = vmax.f32 %v586_v9, 0.0  ;;  %v597_v17 = vadd.f32 %v2638_v4, %v3242_v62  ;;  %v716_v4 = vsub.s32 0, %v715_v2 }
 0x1e2   :  { %876 = vmatprep.mubr.bf16.mxu0 %v2927_v60  ;;  %v588_v7 = vpop.f32.mrf.mxu1 }
 0x1e3   :  { %v589_v11 = vadd.f32 %v3242_v62, %v588_v7  ;;  %v667_v21 = vmax.f32 %v597_v17, 0.0 }
 0x1e4   :  { %v2641_v12 = vpop.f32.mrf.mxu1 }
 0x1e5   :  { %v665_v14 = vmax.f32 %v589_v11, 0.0  ;;  %v689_v23 = vpack.c.bf16 %v667_v21, %v666_v20  ;;  %v610_v32 = vadd.f32 %v2641_v12, %v3242_v62 }
 0x1e6   :  { %v601_v15 = vpop.f32.mrf.mxu1 }
 0x1e7   :  { %v688_v18 = vpack.c.bf16 %v665_v14, %v664_v13  ;;  %v602_v24 = vadd.f32 %v3242_v62, %v601_v15  ;;  %v670_v36 = vmax.f32 %v610_v32, 0.0  ;;  %v2820_v14 = vld [vmem:[#allocation5 + $0x38] sm:$0xff]   ;;  %v2821_v15 = vld [vmem:[#allocation5 + $0x30] sm:$0xff]  }
 0x1e8   :  { %v2642_v19 = vpop.f32.mrf.mxu1  ;;  %2651 = vmatprep.subr.bf16.mxu0 %v2820_v14 }
 0x1e9   :  { %877 = vmatmul.mubr.bf16.gmra.mxu0 %v684_v52  ;;  %v668_v29 = vmax.f32 %v602_v24, 0.0  ;;  %v613_v33 = vadd.f32 %v2642_v19, %v3242_v62 }
 0x1ea   :  { %886 = vmatprep.mubr.bf16.mxu0 %v2927_v60  ;;  %v604_v22 = vpop.f32.mrf.mxu1  ;;  %2652 = vmatpush3.bf16.msra.mxu0 %v2820_v14 }
 0x1eb   :  { %v605_v25 = vadd.f32 %v3242_v62, %v604_v22  ;;  %v671_v37 = vmax.f32 %v613_v33, 0.0  ;;  %2653 = vmatprep.subr.bf16.mxu0 %v2821_v15 }
 0x1ec   :  { %v2645_v26 = vpop.f32.mrf.mxu1 }
 0x1ed   :  { %v669_v30 = vmax.f32 %v605_v25, 0.0  ;;  %v691_v39 = vpack.c.bf16 %v671_v37, %v670_v36  ;;  %v626_v46 = vadd.f32 %v2645_v26, %v3242_v62 }
 0x1ee   :  { %v617_v31 = vpop.f32.mrf.mxu1  ;;  %2654 = vmatpush3.bf16.msra.mxu0 %v2821_v15 }
 0x1ef   :  { %v690_v34 = vpack.c.bf16 %v669_v30, %v668_v29  ;;  %v618_v40 = vadd.f32 %v3242_v62, %v617_v31  ;;  %v674_v50 = vmax.f32 %v626_v46, 0.0  ;;  %v2823_v31 = vld [vmem:[#allocation5 + $0x20] sm:$0xff]  }
 0x1f0   :  { %v2646_v35 = vpop.f32.mrf.mxu1 }
 0x1f1   :  { %887 = vmatmul.mubr.bf16.gmra.mxu0 %v685_v57  ;;  %v672_v43 = vmax.f32 %v618_v40, 0.0  ;;  %v629_v47 = vadd.f32 %v2646_v35, %v3242_v62 }
 0x1f2   :  { %896 = vmatprep.mubr.bf16.mxu0 %v2927_v60  ;;  %v620_v38 = vpop.f32.mrf.mxu1 }
 0x1f3   :  { %v621_v41 = vadd.f32 %v3242_v62, %v620_v38  ;;  %v675_v51 = vmax.f32 %v629_v47, 0.0 }
 0x1f4   :  { %v2649_v42 = vpop.f32.mrf.mxu1 }
 0x1f5   :  { %v673_v44 = vmax.f32 %v621_v41, 0.0  ;;  %v693_v53 = vpack.c.bf16 %v675_v51, %v674_v50  ;;  %v642_v58 = vadd.f32 %v2649_v42, %v3242_v62 }
 0x1f6   :  { %v633_v45 = vpop.f32.mrf.mxu1 }
 0x1f7   :  { %v692_v48 = vpack.c.bf16 %v673_v44, %v672_v43  ;;  %v634_v54 = vadd.f32 %v3242_v62, %v633_v45  ;;  %v678_v10 = vmax.f32 %v642_v58, 0.0 }
 0x1f8   :  { %v2650_v49 = vpop.f32.mrf.mxu1 }
 0x1f9   :  { %897 = vmatmul.mubr.bf16.gmra.mxu0 %v686_v3  ;;  %v676_v56 = vmax.f32 %v634_v54, 0.0  ;;  %v645_v59 = vadd.f32 %v2650_v49, %v3242_v62  ;;  %v720_v3 = vsub.s32 1, %v715_v2 }
 0x1fa   :  { %906 = vmatprep.mubr.bf16.mxu0 %v2927_v60  ;;  %v636_v52 = vpop.f32.mrf.mxu1 }
 0x1fb   :  { %v637_v55 = vadd.f32 %v3242_v62, %v636_v52  ;;  %v679_v63 = vmax.f32 %v645_v59, 0.0  ;;  %v3342_v7 = vrot.slane %v712_v5, %v720_v3  ;;  %v3344_v62 = vrot.slane %v712_v5, %v716_v4 }
 0x1fd   :  { %v677_v57 = vmax.f32 %v637_v55, 0.0  ;;  %v695_v0 = vpack.c.bf16 %v679_v63, %v678_v10 }
 0x1ff   :  { %v694_v61 = vpack.c.bf16 %v677_v57, %v676_v56 }
 0x201   :  { %907 = vmatmul.mubr.bf16.gmra.mxu0 %v687_v8 }
 0x202   :  { %916 = vmatprep.mubr.bf16.mxu0 %v2927_v60 }
 0x209   :  { %917 = vmatmul.mubr.bf16.gmra.mxu0 %v688_v18 }
 0x20a   :  { %926 = vmatprep.mubr.bf16.mxu0 %v2927_v60 }
 0x211   :  { %927 = vmatmul.mubr.bf16.gmra.mxu0 %v689_v23  ;;  %v2822_v23 = vld [vmem:[#allocation5 + $0x28] sm:$0xff]  }
 0x212   :  { %936 = vmatprep.mubr.bf16.mxu0 %v2927_v60  ;;  %2655 = vmatprep.subr.bf16.mxu0 %v2822_v23 }
 0x213   :  { %2656 = vmatpush3.bf16.msra.mxu0 %v2822_v23 }
 0x214   :  { %2657 = vmatprep.subr.bf16.mxu0 %v2823_v31 }
 0x217   :  { %2658 = vmatpush3.bf16.msra.mxu0 %v2823_v31 }
 0x219   :  { %937 = vmatmul.mubr.bf16.gmra.mxu0 %v690_v34 }
 0x21a   :  { %946 = vmatprep.mubr.bf16.mxu0 %v2927_v60 }
 0x221   :  { %947 = vmatmul.mubr.bf16.gmra.mxu0 %v691_v39 }
 0x222   :  { %956 = vmatprep.mubr.bf16.mxu0 %v2927_v60 }
 0x229   :  { %957 = vmatmul.mubr.bf16.gmra.mxu0 %v692_v48 }
 0x22a   :  { %966 = vmatprep.mubr.bf16.mxu0 %v2927_v60 }
 0x231   :  { %967 = vmatmul.mubr.bf16.gmra.mxu0 %v693_v53 }
 0x232   :  { %976 = vmatprep.mubr.bf16.mxu0 %v2927_v60 }
 0x239   :  { %977 = vmatmul.mubr.bf16.gmra.mxu0 %v694_v61 }
 0x23a   :  { %986 = vmatprep.mubr.bf16.mxu0 %v2927_v60 }
 0x241   :  { %987 = vmatmul.mubr.bf16.gmra.mxu0 %v695_v0 }
 0x289   :  { %v838_v6 = vpop.f32.mrf.mxu0 }
 0x28a   :  { %v839_v12 = vadd.f32 %v838_v6, %v3344_v62 }
 0x28b   :  { %v840_v8 = vpop.f32.mrf.mxu0 }
 0x28c   :  { %v841_v60 = vadd.f32 %v840_v8, %v3342_v7  ;;  %v997_v21 = vmax.f32 %v839_v12, 0.0 }
 0x28d   :  { %v842_v9 = vpop.f32.mrf.mxu0 }
 0x28e   :  { %v843_v11 = vadd.f32 %v842_v9, %v3344_v62  ;;  %v998_v19 = vmax.f32 %v841_v60, 0.0 }
 0x28f   :  { %v844_v13 = vpop.f32.mrf.mxu0 }
 0x290   :  { %v845_v16 = vadd.f32 %v844_v13, %v3342_v7  ;;  %v999_v17 = vmax.f32 %v843_v11, 0.0 }
 0x291   :  { %v848_v18 = vpop.f32.mrf.mxu0 }
 0x292   :  { %v1000_v20 = vmax.f32 %v845_v16, 0.0  ;;  %v1061_v25 = vpack.c.bf16 %v999_v17, %v997_v21  ;;  %v849_v29 = vadd.f32 %v848_v18, %v3344_v62 }
 0x293   :  { %v850_v22 = vpop.f32.mrf.mxu0 }
 0x294   :  { %v1062_v24 = vpack.c.bf16 %v1000_v20, %v998_v19  ;;  %v851_v27 = vadd.f32 %v850_v22, %v3342_v7  ;;  %v1001_v37 = vmax.f32 %v849_v29, 0.0 }
 0x295   :  { %v852_v26 = vpop.f32.mrf.mxu0 }
 0x296   :  { %v853_v28 = vadd.f32 %v852_v26, %v3344_v62  ;;  %1260 = vmatprep.mubr.bf16.mxu1 %v1062_v24  ;;  %v1002_v35 = vmax.f32 %v851_v27, 0.0 }
 0x297   :  { %v854_v30 = vpop.f32.mrf.mxu0  ;;  %1261 = vmatmul.mubr.bf16.vlgmr.msra.gmra.mxu1 %v1061_v25 }
 0x298   :  { %v855_v32 = vadd.f32 %v854_v30, %v3342_v7  ;;  %v1003_v33 = vmax.f32 %v853_v28, 0.0 }
 0x299   :  { %v858_v34 = vpop.f32.mrf.mxu0 }
 0x29a   :  { %v1004_v36 = vmax.f32 %v855_v32, 0.0  ;;  %v1063_v40 = vpack.c.bf16 %v1003_v33, %v1001_v37  ;;  %v859_v44 = vadd.f32 %v858_v34, %v3344_v62 }
 0x29b   :  { %v860_v38 = vpop.f32.mrf.mxu0 }
 0x29c   :  { %v1064_v39 = vpack.c.bf16 %v1004_v36, %v1002_v35  ;;  %v861_v42 = vadd.f32 %v860_v38, %v3342_v7  ;;  %v1005_v51 = vmax.f32 %v859_v44, 0.0 }
 0x29d   :  { %v862_v41 = vpop.f32.mrf.mxu0 }
 0x29e   :  { %v863_v43 = vadd.f32 %v862_v41, %v3344_v62  ;;  %1268 = vmatprep.mubr.bf16.mxu1 %v1064_v39  ;;  %v1006_v49 = vmax.f32 %v861_v42, 0.0 }
 0x29f   :  { %v864_v45 = vpop.f32.mrf.mxu0  ;;  %1269 = vmatmul.mubr.bf16.gmra.mxu1 %v1063_v40 }
 0x2a0   :  { %v865_v46 = vadd.f32 %v864_v45, %v3342_v7  ;;  %v1007_v47 = vmax.f32 %v863_v43, 0.0 }
 0x2a1   :  { %v868_v48 = vpop.f32.mrf.mxu0 }
 0x2a2   :  { %v1008_v50 = vmax.f32 %v865_v46, 0.0  ;;  %v1065_v54 = vpack.c.bf16 %v1007_v47, %v1005_v51  ;;  %v869_v58 = vadd.f32 %v868_v48, %v3344_v62 }
 0x2a3   :  { %v870_v52 = vpop.f32.mrf.mxu0 }
 0x2a4   :  { %v1066_v53 = vpack.c.bf16 %v1008_v50, %v1006_v49  ;;  %v871_v56 = vadd.f32 %v870_v52, %v3342_v7  ;;  %v1009_v2 = vmax.f32 %v869_v58, 0.0 }
 0x2a5   :  { %v872_v55 = vpop.f32.mrf.mxu0 }
 0x2a6   :  { %v873_v57 = vadd.f32 %v872_v55, %v3344_v62  ;;  %1276 = vmatprep.mubr.bf16.mxu1 %v1066_v53  ;;  %v1010_v0 = vmax.f32 %v871_v56, 0.0 }
 0x2a7   :  { %v874_v59 = vpop.f32.mrf.mxu0  ;;  %1277 = vmatmul.mubr.bf16.gmra.mxu1 %v1065_v54 }
 0x2a8   :  { %v875_v61 = vadd.f32 %v874_v59, %v3342_v7  ;;  %v1011_v10 = vmax.f32 %v873_v57, 0.0 }
 0x2a9   :  { %v878_v63 = vpop.f32.mrf.mxu0 }
 0x2aa   :  { %v1012_v1 = vmax.f32 %v875_v61, 0.0  ;;  %v1067_v5 = vpack.c.bf16 %v1011_v10, %v1009_v2  ;;  %v879_v60 = vadd.f32 %v878_v63, %v3344_v62 }
 0x2ab   :  { %v880_v3 = vpop.f32.mrf.mxu0 }
 0x2ac   :  { %v1068_v4 = vpack.c.bf16 %v1012_v1, %v1010_v0  ;;  %v881_v8 = vadd.f32 %v880_v3, %v3342_v7  ;;  %v1013_v17 = vmax.f32 %v879_v60, 0.0 }
 0x2ad   :  { %v882_v6 = vpop.f32.mrf.mxu0 }
 0x2ae   :  { %v883_v9 = vadd.f32 %v882_v6, %v3344_v62  ;;  %1284 = vmatprep.mubr.bf16.mxu1 %v1068_v4  ;;  %v1014_v15 = vmax.f32 %v881_v8, 0.0 }
 0x2af   :  { %v884_v11 = vpop.f32.mrf.mxu0  ;;  %1285 = vmatmul.mubr.bf16.gmra.mxu1 %v1067_v5 }
 0x2b0   :  { %v885_v12 = vadd.f32 %v884_v11, %v3342_v7  ;;  %v1015_v13 = vmax.f32 %v883_v9, 0.0 }
 0x2b1   :  { %v888_v14 = vpop.f32.mrf.mxu0 }
 0x2b2   :  { %v1016_v16 = vmax.f32 %v885_v12, 0.0  ;;  %v1069_v20 = vpack.c.bf16 %v1015_v13, %v1013_v17  ;;  %v889_v24 = vadd.f32 %v888_v14, %v3344_v62 }
 0x2b3   :  { %v890_v18 = vpop.f32.mrf.mxu0 }
 0x2b4   :  { %v1070_v19 = vpack.c.bf16 %v1016_v16, %v1014_v15  ;;  %v891_v22 = vadd.f32 %v890_v18, %v3342_v7  ;;  %v1017_v31 = vmax.f32 %v889_v24, 0.0 }
 0x2b5   :  { %v892_v21 = vpop.f32.mrf.mxu0 }
 0x2b6   :  { %v893_v23 = vadd.f32 %v892_v21, %v3344_v62  ;;  %1292 = vmatprep.mubr.bf16.mxu1 %v1070_v19  ;;  %v1018_v29 = vmax.f32 %v891_v22, 0.0 }
 0x2b7   :  { %v894_v25 = vpop.f32.mrf.mxu0  ;;  %1293 = vmatmul.mubr.bf16.gmra.mxu1 %v1069_v20 }
 0x2b8   :  { %v895_v26 = vadd.f32 %v894_v25, %v3342_v7  ;;  %v1019_v27 = vmax.f32 %v893_v23, 0.0 }
 0x2b9   :  { %v898_v28 = vpop.f32.mrf.mxu0 }
 0x2ba   :  { %v1020_v30 = vmax.f32 %v895_v26, 0.0  ;;  %v1071_v34 = vpack.c.bf16 %v1019_v27, %v1017_v31  ;;  %v899_v38 = vadd.f32 %v898_v28, %v3344_v62  ;;  %v2824_v28 = vld [vmem:[#allocation5 + $0x18] sm:$0xff]  }
 0x2bb   :  { %v900_v32 = vpop.f32.mrf.mxu0  ;;  %2659 = vmatprep.subr.bf16.mxu0 %v2824_v28 }
 0x2bc   :  { %v1072_v33 = vpack.c.bf16 %v1020_v30, %v1018_v29  ;;  %v901_v36 = vadd.f32 %v900_v32, %v3342_v7  ;;  %v1021_v45 = vmax.f32 %v899_v38, 0.0  ;;  %2660 = vmatpush3.bf16.msra.mxu0 %v2824_v28 }
 0x2bd   :  { %v902_v35 = vpop.f32.mrf.mxu0 }
 0x2be   :  { %v903_v37 = vadd.f32 %v902_v35, %v3344_v62  ;;  %1300 = vmatprep.mubr.bf16.mxu1 %v1072_v33  ;;  %v1022_v43 = vmax.f32 %v901_v36, 0.0  ;;  %v2825_v36 = vld [vmem:[#allocation5 + $0x10] sm:$0xff]  }
 0x2bf   :  { %v904_v39 = vpop.f32.mrf.mxu0  ;;  %1301 = vmatmul.mubr.bf16.gmra.mxu1 %v1071_v34  ;;  %2661 = vmatprep.subr.bf16.mxu0 %v2825_v36 }
 0x2c0   :  { %v905_v40 = vadd.f32 %v904_v39, %v3342_v7  ;;  %v1023_v41 = vmax.f32 %v903_v37, 0.0  ;;  %2662 = vmatpush3.bf16.msra.mxu0 %v2825_v36 }
 0x2c1   :  { %v908_v42 = vpop.f32.mrf.mxu0 }
 0x2c2   :  { %v1024_v44 = vmax.f32 %v905_v40, 0.0  ;;  %v1073_v48 = vpack.c.bf16 %v1023_v41, %v1021_v45  ;;  %v909_v52 = vadd.f32 %v908_v42, %v3344_v62 }
 0x2c3   :  { %v910_v46 = vpop.f32.mrf.mxu0 }
 0x2c4   :  { %v1074_v47 = vpack.c.bf16 %v1024_v44, %v1022_v43  ;;  %v911_v50 = vadd.f32 %v910_v46, %v3342_v7  ;;  %v1025_v59 = vmax.f32 %v909_v52, 0.0  ;;  %v2826_v44 = vld [vmem:[#allocation5 + $0x8] sm:$0xff]   ;;  %v2827_v52 = vld [vmem:[#allocation5] sm:$0xff]  }
 0x2c5   :  { %v912_v49 = vpop.f32.mrf.mxu0  ;;  %2663 = vmatprep.subr.bf16.mxu0 %v2826_v44 }
 0x2c6   :  { %v913_v51 = vadd.f32 %v912_v49, %v3344_v62  ;;  %1308 = vmatprep.mubr.bf16.mxu1 %v1074_v47  ;;  %v1026_v57 = vmax.f32 %v911_v50, 0.0  ;;  %2664 = vmatpush3.bf16.msra.mxu0 %v2826_v44 }
 0x2c7   :  { %v914_v53 = vpop.f32.mrf.mxu0  ;;  %1309 = vmatmul.mubr.bf16.gmra.mxu1 %v1073_v48  ;;  %2665 = vmatprep.subr.bf16.mxu0 %v2827_v52 }
 0x2c8   :  { %v915_v54 = vadd.f32 %v914_v53, %v3342_v7  ;;  %v1027_v55 = vmax.f32 %v913_v51, 0.0 }
 0x2c9   :  { %v918_v56 = vpop.f32.mrf.mxu0 }
 0x2ca   :  { %v1028_v58 = vmax.f32 %v915_v54, 0.0  ;;  %v1075_v63 = vpack.c.bf16 %v1027_v55, %v1025_v59  ;;  %v919_v3 = vadd.f32 %v918_v56, %v3344_v62  ;;  %2666 = vmatpush3.bf16.msra.mxu0 %v2827_v52 }
 0x2cb   :  { %v920_v61 = vpop.f32.mrf.mxu0 }
 0x2cc   :  { %v1076_v10 = vpack.c.bf16 %v1028_v58, %v1026_v57  ;;  %v921_v1 = vadd.f32 %v920_v61, %v3342_v7  ;;  %v1029_v11 = vmax.f32 %v919_v3, 0.0 }
 0x2cd   :  { %v922_v0 = vpop.f32.mrf.mxu0 }
 0x2ce   :  { %v923_v2 = vadd.f32 %v922_v0, %v3344_v62  ;;  %1316 = vmatprep.mubr.bf16.mxu1 %v1076_v10  ;;  %v1030_v9 = vmax.f32 %v921_v1, 0.0 }
 0x2cf   :  { %v924_v4 = vpop.f32.mrf.mxu0  ;;  %1317 = vmatmul.mubr.bf16.gmra.mxu1 %v1075_v63 }
 0x2d0   :  { %v925_v5 = vadd.f32 %v924_v4, %v3342_v7  ;;  %v1031_v6 = vmax.f32 %v923_v2, 0.0 }
 0x2d1   :  { %v928_v8 = vpop.f32.mrf.mxu0 }
 0x2d2   :  { %v1032_v60 = vmax.f32 %v925_v5, 0.0  ;;  %v1077_v14 = vpack.c.bf16 %v1031_v6, %v1029_v11  ;;  %v929_v18 = vadd.f32 %v928_v8, %v3344_v62 }
 0x2d3   :  { %v930_v12 = vpop.f32.mrf.mxu0 }
 0x2d4   :  { %v1078_v13 = vpack.c.bf16 %v1032_v60, %v1030_v9  ;;  %v931_v16 = vadd.f32 %v930_v12, %v3342_v7  ;;  %v1033_v25 = vmax.f32 %v929_v18, 0.0 }
 0x2d5   :  { %v932_v15 = vpop.f32.mrf.mxu0 }
 0x2d6   :  { %v933_v17 = vadd.f32 %v932_v15, %v3344_v62  ;;  %1324 = vmatprep.mubr.bf16.mxu1 %v1078_v13  ;;  %v1034_v23 = vmax.f32 %v931_v16, 0.0 }
 0x2d7   :  { %v934_v19 = vpop.f32.mrf.mxu0  ;;  %1325 = vmatmul.mubr.bf16.gmra.mxu1 %v1077_v14 }
 0x2d8   :  { %v935_v20 = vadd.f32 %v934_v19, %v3342_v7  ;;  %v1035_v21 = vmax.f32 %v933_v17, 0.0 }
 0x2d9   :  { %v938_v22 = vpop.f32.mrf.mxu0 }
 0x2da   :  { %v1036_v24 = vmax.f32 %v935_v20, 0.0  ;;  %v1079_v29 = vpack.c.bf16 %v1035_v21, %v1033_v25  ;;  %v939_v33 = vadd.f32 %v938_v22, %v3344_v62 }
 0x2db   :  { %v940_v26 = vpop.f32.mrf.mxu0 }
 0x2dc   :  { %v1080_v27 = vpack.c.bf16 %v1036_v24, %v1034_v23  ;;  %v941_v31 = vadd.f32 %v940_v26, %v3342_v7  ;;  %v1037_v41 = vmax.f32 %v939_v33, 0.0 }
 0x2dd   :  { %v942_v30 = vpop.f32.mrf.mxu0 }
 0x2de   :  { %v943_v32 = vadd.f32 %v942_v30, %v3344_v62  ;;  %1332 = vmatprep.mubr.bf16.mxu1 %v1080_v27  ;;  %v1038_v39 = vmax.f32 %v941_v31, 0.0 }
 0x2df   :  { %v944_v34 = vpop.f32.mrf.mxu0  ;;  %1333 = vmatmul.mubr.bf16.gmra.mxu1 %v1079_v29 }
 0x2e0   :  { %v945_v35 = vadd.f32 %v944_v34, %v3342_v7  ;;  %v1039_v37 = vmax.f32 %v943_v32, 0.0 }
 0x2e1   :  { %v948_v38 = vpop.f32.mrf.mxu0 }
 0x2e2   :  { %v1040_v40 = vmax.f32 %v945_v35, 0.0  ;;  %v1081_v45 = vpack.c.bf16 %v1039_v37, %v1037_v41  ;;  %v949_v49 = vadd.f32 %v948_v38, %v3344_v62 }
 0x2e3   :  { %v950_v42 = vpop.f32.mrf.mxu0 }
 0x2e4   :  { %v1082_v43 = vpack.c.bf16 %v1040_v40, %v1038_v39  ;;  %v951_v47 = vadd.f32 %v950_v42, %v3342_v7  ;;  %v1041_v57 = vmax.f32 %v949_v49, 0.0 }
 0x2e5   :  { %v952_v46 = vpop.f32.mrf.mxu0 }
 0x2e6   :  { %v953_v48 = vadd.f32 %v952_v46, %v3344_v62  ;;  %1340 = vmatprep.mubr.bf16.mxu1 %v1082_v43  ;;  %v1042_v55 = vmax.f32 %v951_v47, 0.0 }
 0x2e7   :  { %v954_v50 = vpop.f32.mrf.mxu0  ;;  %1341 = vmatmul.mubr.bf16.gmra.mxu1 %v1081_v45 }
 0x2e8   :  { %v955_v51 = vadd.f32 %v954_v50, %v3342_v7  ;;  %v1043_v53 = vmax.f32 %v953_v48, 0.0 }
 0x2e9   :  { %v958_v54 = vpop.f32.mrf.mxu0 }
 0x2ea   :  { %v1044_v56 = vmax.f32 %v955_v51, 0.0  ;;  %v1083_v61 = vpack.c.bf16 %v1043_v53, %v1041_v57  ;;  %v959_v1 = vadd.f32 %v958_v54, %v3344_v62 }
 0x2eb   :  { %v960_v58 = vpop.f32.mrf.mxu0 }
 0x2ec   :  { %v1084_v59 = vpack.c.bf16 %v1044_v56, %v1042_v55  ;;  %v961_v63 = vadd.f32 %v960_v58, %v3342_v7  ;;  %v1045_v9 = vmax.f32 %v959_v1, 0.0  ;;  %v3413_v56 = vld [vmem:[%s3535_s8] ss:$0 sm:$0xff] }
 0x2ed   :  { %v962_v10 = vpop.f32.mrf.mxu0 }
 0x2ee   :  { %v963_v0 = vadd.f32 %v962_v10, %v3344_v62  ;;  %1348 = vmatprep.mubr.bf16.mxu1 %v1084_v59  ;;  %v1046_v6 = vmax.f32 %v961_v63, 0.0  ;;  %v2828_v59 = vld [vmem:[#allocation7 + $0x38] sm:$0xff]   ;;  %v2829_v63 = vld [vmem:[#allocation7 + $0x30] sm:$0xff]  }
 0x2ef   :  { %v964_v2 = vpop.f32.mrf.mxu0  ;;  %1349 = vmatmul.mubr.bf16.gmra.mxu1 %v1083_v61  ;;  %2747 = vmatprep.subr.bf16.mxu1 %v2828_v59 }
 0x2f0   :  { %v965_v3 = vadd.f32 %v964_v2, %v3342_v7  ;;  %v1047_v4 = vmax.f32 %v963_v0, 0.0  ;;  %2699 = vmatprep.subr.bf16.mxu0 %v2828_v59  ;;  %2755 = vmatpush3.bf16.msra.mxu1 %v2828_v59 }
 0x2f1   :  { %v968_v5 = vpop.f32.mrf.mxu0  ;;  %2748 = vmatprep.subr.bf16.mxu1 %v2829_v63 }
 0x2f2   :  { %v1048_v8 = vmax.f32 %v965_v3, 0.0  ;;  %v1085_v12 = vpack.c.bf16 %v1047_v4, %v1045_v9  ;;  %v969_v16 = vadd.f32 %v968_v5, %v3344_v62 }
 0x2f3   :  { %v970_v60 = vpop.f32.mrf.mxu0 }
 0x2f4   :  { %v1086_v11 = vpack.c.bf16 %v1048_v8, %v1046_v6  ;;  %v971_v14 = vadd.f32 %v970_v60, %v3342_v7  ;;  %v1049_v23 = vmax.f32 %v969_v16, 0.0  ;;  %v2830_v6 = vld [vmem:[#allocation7 + $0x28] sm:$0xff]   ;;  %2756 = vmatpush3.bf16.msra.mxu1 %v2829_v63 }
 0x2f5   :  { %v972_v13 = vpop.f32.mrf.mxu0  ;;  %2749 = vmatprep.subr.bf16.mxu1 %v2830_v6 }
 0x2f6   :  { %v973_v15 = vadd.f32 %v972_v13, %v3344_v62  ;;  %1356 = vmatprep.mubr.bf16.mxu1 %v1086_v11  ;;  %v1050_v21 = vmax.f32 %v971_v14, 0.0  ;;  %v2831_v13 = vld [vmem:[#allocation7 + $0x20] sm:$0xff]  }
 0x2f7   :  { %v974_v17 = vpop.f32.mrf.mxu0  ;;  %1357 = vmatmul.mubr.bf16.gmra.mxu1 %v1085_v12 }
 0x2f8   :  { %v975_v18 = vadd.f32 %v974_v17, %v3342_v7  ;;  %v1051_v19 = vmax.f32 %v973_v15, 0.0  ;;  %2757 = vmatpush3.bf16.msra.mxu1 %v2830_v6 }
 0x2f9   :  { %v978_v20 = vpop.f32.mrf.mxu0  ;;  %2750 = vmatprep.subr.bf16.mxu1 %v2831_v13 }
 0x2fa   :  { %v1052_v22 = vmax.f32 %v975_v18, 0.0  ;;  %v1087_v26 = vpack.c.bf16 %v1051_v19, %v1049_v23  ;;  %v979_v30 = vadd.f32 %v978_v20, %v3344_v62  ;;  %v2832_v20 = vld [vmem:[#allocation7 + $0x18] sm:$0xff]  }
 0x2fb   :  { %v980_v24 = vpop.f32.mrf.mxu0 }
 0x2fc   :  { %v1088_v25 = vpack.c.bf16 %v1052_v22, %v1050_v21  ;;  %v981_v28 = vadd.f32 %v980_v24, %v3342_v7  ;;  %v1053_v37 = vmax.f32 %v979_v30, 0.0  ;;  %2758 = vmatpush3.bf16.msra.mxu1 %v2831_v13 }
 0x2fd   :  { %v982_v27 = vpop.f32.mrf.mxu0  ;;  %2751 = vmatprep.subr.bf16.mxu1 %v2832_v20 }
 0x2fe   :  { %v983_v29 = vadd.f32 %v982_v27, %v3344_v62  ;;  %1364 = vmatprep.mubr.bf16.mxu1 %v1088_v25  ;;  %v1054_v35 = vmax.f32 %v981_v28, 0.0 }
 0x2ff   :  { %v984_v31 = vpop.f32.mrf.mxu0  ;;  %1365 = vmatmul.mubr.bf16.gmra.mxu1 %v1087_v26 }
 0x300   :  { %v985_v32 = vadd.f32 %v984_v31, %v3342_v7  ;;  %v1055_v33 = vmax.f32 %v983_v29, 0.0  ;;  %2759 = vmatpush3.bf16.msra.mxu1 %v2832_v20 }
 0x301   :  { %v988_v34 = vpop.f32.mrf.mxu0 }
 0x302   :  { %v1056_v36 = vmax.f32 %v985_v32, 0.0  ;;  %v1089_v40 = vpack.c.bf16 %v1055_v33, %v1053_v37  ;;  %v989_v44 = vadd.f32 %v988_v34, %v3344_v62 }
 0x303   :  { %v990_v38 = vpop.f32.mrf.mxu0 }
 0x304   :  { %v1090_v39 = vpack.c.bf16 %v1056_v36, %v1054_v35  ;;  %v991_v42 = vadd.f32 %v990_v38, %v3342_v7  ;;  %v1057_v50 = vmax.f32 %v989_v44, 0.0 }
 0x305   :  { %v992_v41 = vpop.f32.mrf.mxu0 }
 0x306   :  { %v993_v43 = vadd.f32 %v992_v41, %v3344_v62  ;;  %1372 = vmatprep.mubr.bf16.mxu1 %v1090_v39  ;;  %v1058_v48 = vmax.f32 %v991_v42, 0.0 }
 0x307   :  { %v994_v45 = vpop.f32.mrf.mxu0  ;;  %1373 = vmatmul.mubr.bf16.gmra.mxu1 %v1089_v40 }
 0x308   :  { %v995_v46 = vadd.f32 %v994_v45, %v3342_v7  ;;  %v1059_v47 = vmax.f32 %v993_v43, 0.0 }
 0x30a   :  { %v1060_v49 = vmax.f32 %v995_v46, 0.0  ;;  %v1091_v52 = vpack.c.bf16 %v1059_v47, %v1057_v50 }
 0x30c   :  { %v1092_v51 = vpack.c.bf16 %v1060_v49, %v1058_v48 }
 0x30e   :  { %1380 = vmatprep.mubr.bf16.mxu1 %v1092_v51 }
 0x30f   :  { %1381 = vmatmul.mubr.bf16.gmra.mxu1 %v1091_v52 }
 0x357   :  { %v2423_v53 = vpop.f32.mrf.mxu1 }
 0x359   :  { %v2424_v54 = vpop.f32.mrf.mxu1 }
 0x35a   :  { %v2425_v55 = vadd.f32 %v2424_v54, %v2423_v53 }
 0x35b   :  { %v2426_v62 = vpop.f32.mrf.mxu1 }
 0x35c   :  { %v1263_v7 = vadd.f32 %v2425_v55, %v3413_v56 }
 0x35d   :  { %v2427_v57 = vpop.f32.mrf.mxu1 }
 0x35e   :  { %v2428_v58 = vadd.f32 %v2427_v57, %v2426_v62  ;;  %v1389_v1 = vmax.f32 %v1263_v7, 0.0 }
 0x35f   :  { %v2429_v61 = vpop.f32.mrf.mxu1 }
 0x360   :  { %v1266_v10 = vadd.f32 %v2428_v58, %v3413_v56 }
 0x361   :  { %v2430_v0 = vpop.f32.mrf.mxu1 }
 0x362   :  { %v1390_v2 = vmax.f32 %v1266_v10, 0.0  ;;  %v2431_v3 = vadd.f32 %v2430_v0, %v2429_v61 }
 0x363   :  { %v2432_v4 = vpop.f32.mrf.mxu1 }
 0x364   :  { %v1421_v5 = vpack.c.bf16 %v1390_v2, %v1389_v1  ;;  %v1271_v9 = vadd.f32 %v2431_v3, %v3413_v56 }
 0x365   :  { %v2433_v8 = vpop.f32.mrf.mxu1 }
 0x366   :  { %v2434_v60 = vadd.f32 %v2433_v8, %v2432_v4  ;;  %2667 = vmatprep.mubr.bf16.mxu0 %v1421_v5  ;;  %v1391_v15 = vmax.f32 %v1271_v9, 0.0 }
 0x367   :  { %v2435_v11 = vpop.f32.mrf.mxu1 }
 0x368   :  { %v1274_v12 = vadd.f32 %v2434_v60, %v3413_v56 }
 0x369   :  { %v2436_v14 = vpop.f32.mrf.mxu1 }
 0x36a   :  { %v1392_v16 = vmax.f32 %v1274_v12, 0.0  ;;  %v2437_v17 = vadd.f32 %v2436_v14, %v2435_v11 }
 0x36b   :  { %v2438_v18 = vpop.f32.mrf.mxu1 }
 0x36c   :  { %v1422_v19 = vpack.c.bf16 %v1392_v16, %v1391_v15  ;;  %v1279_v22 = vadd.f32 %v2437_v17, %v3413_v56 }
 0x36d   :  { %v2439_v21 = vpop.f32.mrf.mxu1 }
 0x36e   :  { %v2440_v23 = vadd.f32 %v2439_v21, %v2438_v18  ;;  %2668 = vmatmul.mubr.bf16.vlgmr.msra.gmra.mxu0 %v1422_v19  ;;  %v1393_v27 = vmax.f32 %v1279_v22, 0.0 }
 0x36f   :  { %v2441_v24 = vpop.f32.mrf.mxu1  ;;  %2700 = vmatpush3.bf16.msra.mxu0 %v2828_v59 }
 0x370   :  { %v1282_v25 = vadd.f32 %v2440_v23, %v3413_v56  ;;  %2701 = vmatprep.subr.bf16.mxu0 %v2829_v63 }
 0x371   :  { %v2442_v26 = vpop.f32.mrf.mxu1 }
 0x372   :  { %v1394_v28 = vmax.f32 %v1282_v25, 0.0  ;;  %v2443_v29 = vadd.f32 %v2442_v26, %v2441_v24 }
 0x373   :  { %v2444_v30 = vpop.f32.mrf.mxu1  ;;  %2702 = vmatpush3.bf16.msra.mxu0 %v2829_v63 }
 0x374   :  { %v1423_v31 = vpack.c.bf16 %v1394_v28, %v1393_v27  ;;  %2703 = vmatprep.subr.bf16.mxu0 %v2830_v6  ;;  %v1287_v33 = vadd.f32 %v2443_v29, %v3413_v56 }
 0x375   :  { %v2445_v32 = vpop.f32.mrf.mxu1 }
 0x376   :  { %v2446_v34 = vadd.f32 %v2445_v32, %v2444_v30  ;;  %2671 = vmatprep.mubr.bf16.mxu0 %v1423_v31  ;;  %v1395_v38 = vmax.f32 %v1287_v33, 0.0 }
 0x377   :  { %v2447_v35 = vpop.f32.mrf.mxu1  ;;  %2704 = vmatpush3.bf16.msra.mxu0 %v2830_v6 }
 0x378   :  { %v1290_v36 = vadd.f32 %v2446_v34, %v3413_v56  ;;  %2705 = vmatprep.subr.bf16.mxu0 %v2831_v13 }
 0x379   :  { %v2448_v37 = vpop.f32.mrf.mxu1 }
 0x37a   :  { %v1396_v39 = vmax.f32 %v1290_v36, 0.0  ;;  %v2449_v40 = vadd.f32 %v2448_v37, %v2447_v35 }
 0x37b   :  { %v2450_v41 = vpop.f32.mrf.mxu1  ;;  %2706 = vmatpush3.bf16.msra.mxu0 %v2831_v13 }
 0x37c   :  { %v1424_v42 = vpack.c.bf16 %v1396_v39, %v1395_v38  ;;  %2707 = vmatprep.subr.bf16.mxu0 %v2832_v20  ;;  %v1295_v44 = vadd.f32 %v2449_v40, %v3413_v56 }
 0x37d   :  { %v2451_v43 = vpop.f32.mrf.mxu1 }
 0x37e   :  { %v2452_v45 = vadd.f32 %v2451_v43, %v2450_v41  ;;  %2672 = vmatmul.mubr.bf16.gmra.mxu0 %v1424_v42  ;;  %v1397_v49 = vmax.f32 %v1295_v44, 0.0 }
 0x37f   :  { %v2453_v46 = vpop.f32.mrf.mxu1  ;;  %2708 = vmatpush3.bf16.msra.mxu0 %v2832_v20 }
 0x380   :  { %v1298_v47 = vadd.f32 %v2452_v45, %v3413_v56 }
 0x381   :  { %v2454_v48 = vpop.f32.mrf.mxu1 }
 0x382   :  { %v1398_v50 = vmax.f32 %v1298_v47, 0.0  ;;  %v2455_v51 = vadd.f32 %v2454_v48, %v2453_v46 }
 0x383   :  { %v2456_v52 = vpop.f32.mrf.mxu1 }
 0x384   :  { %v1425_v53 = vpack.c.bf16 %v1398_v50, %v1397_v49  ;;  %v1303_v55 = vadd.f32 %v2455_v51, %v3413_v56  ;;  %v2833_v49 = vld [vmem:[#allocation7 + $0x10] sm:$0xff]  }
 0x385   :  { %v2457_v54 = vpop.f32.mrf.mxu1  ;;  %2709 = vmatprep.subr.bf16.mxu0 %v2833_v49  ;;  %2752 = vmatprep.subr.bf16.mxu1 %v2833_v49 }
 0x386   :  { %v2458_v62 = vadd.f32 %v2457_v54, %v2456_v52  ;;  %2675 = vmatprep.mubr.bf16.mxu0 %v1425_v53  ;;  %v1399_v59 = vmax.f32 %v1303_v55, 0.0  ;;  %2710 = vmatpush3.bf16.msra.mxu0 %v2833_v49 }
 0x387   :  { %v2459_v57 = vpop.f32.mrf.mxu1  ;;  %2760 = vmatpush3.bf16.msra.mxu1 %v2833_v49 }
 0x388   :  { %v1306_v7 = vadd.f32 %v2458_v62, %v3413_v56  ;;  %v2834_v62 = vld [vmem:[#allocation7 + $0x8] sm:$0xff]  }
 0x389   :  { %v2460_v58 = vpop.f32.mrf.mxu1  ;;  %2711 = vmatprep.subr.bf16.mxu0 %v2834_v62  ;;  %2753 = vmatprep.subr.bf16.mxu1 %v2834_v62 }
 0x38a   :  { %v1400_v61 = vmax.f32 %v1306_v7, 0.0  ;;  %v2461_v10 = vadd.f32 %v2460_v58, %v2459_v57  ;;  %2712 = vmatpush3.bf16.msra.mxu0 %v2834_v62 }
 0x38b   :  { %v2462_v63 = vpop.f32.mrf.mxu1  ;;  %2761 = vmatpush3.bf16.msra.mxu1 %v2834_v62 }
 0x38c   :  { %v1426_v0 = vpack.c.bf16 %v1400_v61, %v1399_v59  ;;  %v1311_v2 = vadd.f32 %v2461_v10, %v3413_v56  ;;  %v2835_v10 = vld [vmem:[#allocation7] sm:$0xff]  }
 0x38d   :  { %v2463_v1 = vpop.f32.mrf.mxu1  ;;  %2713 = vmatprep.subr.bf16.mxu0 %v2835_v10  ;;  %2754 = vmatprep.subr.bf16.mxu1 %v2835_v10 }
 0x38e   :  { %v2464_v3 = vadd.f32 %v2463_v1, %v2462_v63  ;;  %2676 = vmatmul.mubr.bf16.gmra.mxu0 %v1426_v0  ;;  %v1401_v8 = vmax.f32 %v1311_v2, 0.0 }
 0x38f   :  { %v2465_v4 = vpop.f32.mrf.mxu1  ;;  %2714 = vmatpush3.bf16.msra.mxu0 %v2835_v10  ;;  %2762 = vmatpush3.bf16.msra.mxu1 %v2835_v10 }
 0x390   :  { %v1314_v5 = vadd.f32 %v2464_v3, %v3413_v56 }
 0x391   :  { %v2466_v6 = vpop.f32.mrf.mxu1 }
 0x392   :  { %v1402_v9 = vmax.f32 %v1314_v5, 0.0  ;;  %v2467_v60 = vadd.f32 %v2466_v6, %v2465_v4 }
 0x393   :  { %v2468_v11 = vpop.f32.mrf.mxu1 }
 0x394   :  { %v1427_v12 = vpack.c.bf16 %v1402_v9, %v1401_v8  ;;  %v1319_v14 = vadd.f32 %v2467_v60, %v3413_v56 }
 0x395   :  { %v2469_v13 = vpop.f32.mrf.mxu1 }
 0x396   :  { %v2470_v15 = vadd.f32 %v2469_v13, %v2468_v11  ;;  %2679 = vmatprep.mubr.bf16.mxu0 %v1427_v12  ;;  %v1403_v19 = vmax.f32 %v1319_v14, 0.0 }
 0x397   :  { %v2471_v16 = vpop.f32.mrf.mxu1 }
 0x398   :  { %v1322_v17 = vadd.f32 %v2470_v15, %v3413_v56 }
 0x399   :  { %v2472_v18 = vpop.f32.mrf.mxu1 }
 0x39a   :  { %v1404_v20 = vmax.f32 %v1322_v17, 0.0  ;;  %v2473_v21 = vadd.f32 %v2472_v18, %v2471_v16 }
 0x39b   :  { %v2474_v22 = vpop.f32.mrf.mxu1 }
 0x39c   :  { %v1428_v23 = vpack.c.bf16 %v1404_v20, %v1403_v19  ;;  %v1327_v25 = vadd.f32 %v2473_v21, %v3413_v56 }
 0x39d   :  { %v2475_v24 = vpop.f32.mrf.mxu1 }
 0x39e   :  { %v2476_v26 = vadd.f32 %v2475_v24, %v2474_v22  ;;  %2680 = vmatmul.mubr.bf16.gmra.mxu0 %v1428_v23  ;;  %v1405_v30 = vmax.f32 %v1327_v25, 0.0 }
 0x39f   :  { %v2477_v27 = vpop.f32.mrf.mxu1 }
 0x3a0   :  { %v1330_v28 = vadd.f32 %v2476_v26, %v3413_v56 }
 0x3a1   :  { %v2478_v29 = vpop.f32.mrf.mxu1 }
 0x3a2   :  { %v1406_v31 = vmax.f32 %v1330_v28, 0.0  ;;  %v2479_v32 = vadd.f32 %v2478_v29, %v2477_v27 }
 0x3a3   :  { %v2480_v33 = vpop.f32.mrf.mxu1 }
 0x3a4   :  { %v1429_v34 = vpack.c.bf16 %v1406_v31, %v1405_v30  ;;  %v1335_v36 = vadd.f32 %v2479_v32, %v3413_v56 }
 0x3a5   :  { %v2481_v35 = vpop.f32.mrf.mxu1 }
 0x3a6   :  { %v2482_v37 = vadd.f32 %v2481_v35, %v2480_v33  ;;  %2683 = vmatprep.mubr.bf16.mxu0 %v1429_v34  ;;  %v1407_v41 = vmax.f32 %v1335_v36, 0.0 }
 0x3a7   :  { %v2483_v38 = vpop.f32.mrf.mxu1 }
 0x3a8   :  { %v1338_v39 = vadd.f32 %v2482_v37, %v3413_v56 }
 0x3a9   :  { %v2484_v40 = vpop.f32.mrf.mxu1 }
 0x3aa   :  { %v1408_v42 = vmax.f32 %v1338_v39, 0.0  ;;  %v2485_v43 = vadd.f32 %v2484_v40, %v2483_v38 }
 0x3ab   :  { %v2486_v44 = vpop.f32.mrf.mxu1 }
 0x3ac   :  { %v1430_v45 = vpack.c.bf16 %v1408_v42, %v1407_v41  ;;  %v1343_v47 = vadd.f32 %v2485_v43, %v3413_v56 }
 0x3ad   :  { %v2487_v46 = vpop.f32.mrf.mxu1 }
 0x3ae   :  { %v2488_v48 = vadd.f32 %v2487_v46, %v2486_v44  ;;  %2684 = vmatmul.mubr.bf16.gmra.mxu0 %v1430_v45  ;;  %v1409_v53 = vmax.f32 %v1343_v47, 0.0 }
 0x3af   :  { %v2489_v50 = vpop.f32.mrf.mxu1 }
 0x3b0   :  { %v1346_v51 = vadd.f32 %v2488_v48, %v3413_v56 }
 0x3b1   :  { %v2490_v52 = vpop.f32.mrf.mxu1 }
 0x3b2   :  { %v1410_v54 = vmax.f32 %v1346_v51, 0.0  ;;  %v2491_v55 = vadd.f32 %v2490_v52, %v2489_v50  ;;  %v3450_v50 = vld [vmem:[%s3537_s10] ss:$0 sm:$0xff] }
 0x3b3   :  { %v2492_v57 = vpop.f32.mrf.mxu1 }
 0x3b4   :  { %v1431_v7 = vpack.c.bf16 %v1410_v54, %v1409_v53  ;;  %v1351_v59 = vadd.f32 %v2491_v55, %v3413_v56 }
 0x3b5   :  { %v2493_v58 = vpop.f32.mrf.mxu1 }
 0x3b6   :  { %v2494_v61 = vadd.f32 %v2493_v58, %v2492_v57  ;;  %2687 = vmatprep.mubr.bf16.mxu0 %v1431_v7  ;;  %v1411_v2 = vmax.f32 %v1351_v59, 0.0 }
 0x3b7   :  { %v2495_v63 = vpop.f32.mrf.mxu1 }
 0x3b8   :  { %v1354_v0 = vadd.f32 %v2494_v61, %v3413_v56 }
 0x3b9   :  { %v2496_v1 = vpop.f32.mrf.mxu1 }
 0x3ba   :  { %v1412_v3 = vmax.f32 %v1354_v0, 0.0  ;;  %v2497_v4 = vadd.f32 %v2496_v1, %v2495_v63 }
 0x3bb   :  { %v2498_v5 = vpop.f32.mrf.mxu1 }
 0x3bc   :  { %v1432_v6 = vpack.c.bf16 %v1412_v3, %v1411_v2  ;;  %v1359_v9 = vadd.f32 %v2497_v4, %v3413_v56 }
 0x3bd   :  { %v2499_v8 = vpop.f32.mrf.mxu1 }
 0x3be   :  { %v2500_v60 = vadd.f32 %v2499_v8, %v2498_v5  ;;  %2688 = vmatmul.mubr.bf16.gmra.mxu0 %v1432_v6  ;;  %v1413_v14 = vmax.f32 %v1359_v9, 0.0 }
 0x3bf   :  { %v2501_v11 = vpop.f32.mrf.mxu1 }
 0x3c0   :  { %v1362_v12 = vadd.f32 %v2500_v60, %v3413_v56 }
 0x3c1   :  { %v2502_v13 = vpop.f32.mrf.mxu1 }
 0x3c2   :  { %v1414_v15 = vmax.f32 %v1362_v12, 0.0  ;;  %v2503_v16 = vadd.f32 %v2502_v13, %v2501_v11 }
 0x3c3   :  { %v2504_v17 = vpop.f32.mrf.mxu1 }
 0x3c4   :  { %v1433_v18 = vpack.c.bf16 %v1414_v15, %v1413_v14  ;;  %v1367_v20 = vadd.f32 %v2503_v16, %v3413_v56 }
 0x3c5   :  { %v2505_v19 = vpop.f32.mrf.mxu1 }
 0x3c6   :  { %v2506_v21 = vadd.f32 %v2505_v19, %v2504_v17  ;;  %2691 = vmatprep.mubr.bf16.mxu0 %v1433_v18  ;;  %v1415_v25 = vmax.f32 %v1367_v20, 0.0 }
 0x3c7   :  { %v2507_v22 = vpop.f32.mrf.mxu1 }
 0x3c8   :  { %v1370_v23 = vadd.f32 %v2506_v21, %v3413_v56 }
 0x3c9   :  { %v2508_v24 = vpop.f32.mrf.mxu1 }
 0x3ca   :  { %v1416_v26 = vmax.f32 %v1370_v23, 0.0  ;;  %v2509_v27 = vadd.f32 %v2508_v24, %v2507_v22 }
 0x3cb   :  { %v2510_v28 = vpop.f32.mrf.mxu1 }
 0x3cc   :  { %v1434_v29 = vpack.c.bf16 %v1416_v26, %v1415_v25  ;;  %v1375_v31 = vadd.f32 %v2509_v27, %v3413_v56 }
 0x3cd   :  { %v2511_v30 = vpop.f32.mrf.mxu1 }
 0x3ce   :  { %v2512_v32 = vadd.f32 %v2511_v30, %v2510_v28  ;;  %2692 = vmatmul.mubr.bf16.gmra.mxu0 %v1434_v29  ;;  %v1417_v36 = vmax.f32 %v1375_v31, 0.0 }
 0x3cf   :  { %v2513_v33 = vpop.f32.mrf.mxu1 }
 0x3d0   :  { %v1378_v34 = vadd.f32 %v2512_v32, %v3413_v56 }
 0x3d1   :  { %v2514_v35 = vpop.f32.mrf.mxu1 }
 0x3d2   :  { %v1418_v37 = vmax.f32 %v1378_v34, 0.0  ;;  %v2515_v38 = vadd.f32 %v2514_v35, %v2513_v33 }
 0x3d3   :  { %v2516_v39 = vpop.f32.mrf.mxu1 }
 0x3d4   :  { %v1435_v40 = vpack.c.bf16 %v1418_v37, %v1417_v36  ;;  %v1383_v42 = vadd.f32 %v2515_v38, %v3413_v56 }
 0x3d5   :  { %v2517_v41 = vpop.f32.mrf.mxu1 }
 0x3d6   :  { %v2518_v43 = vadd.f32 %v2517_v41, %v2516_v39  ;;  %2695 = vmatprep.mubr.bf16.mxu0 %v1435_v40  ;;  %v1419_v45 = vmax.f32 %v1383_v42, 0.0 }
 0x3d8   :  { %v1386_v44 = vadd.f32 %v2518_v43, %v3413_v56 }
 0x3da   :  { %v1420_v46 = vmax.f32 %v1386_v44, 0.0 }
 0x3dc   :  { %v1436_v47 = vpack.c.bf16 %v1420_v46, %v1419_v45 }
 0x3de   :  { %2696 = vmatmul.mubr.bf16.gmra.mxu0 %v1436_v47 }
 0x42e   :  { %v2669_v48 = vpop.f32.mrf.mxu0 }
 0x42f   :  { %v1551_v54 = vadd.f32 %v2669_v48, %v3450_v50 }
 0x430   :  { %v1542_v49 = vpop.f32.mrf.mxu0 }
 0x431   :  { %v1543_v52 = vadd.f32 %v3450_v50, %v1542_v49  ;;  %v1671_v58 = vmax.f32 %v1551_v54, 0.0 }
 0x432   :  { %v2670_v51 = vpop.f32.mrf.mxu0 }
 0x433   :  { %v1554_v53 = vadd.f32 %v2670_v51, %v3450_v50  ;;  %v1669_v57 = vmax.f32 %v1543_v52, 0.0 }
 0x434   :  { %v1545_v55 = vpop.f32.mrf.mxu0 }
 0x435   :  { %v1546_v56 = vadd.f32 %v3450_v50, %v1545_v55  ;;  %v1672_v62 = vmax.f32 %v1554_v53, 0.0 }
 0x437   :  { %v1670_v7 = vmax.f32 %v1546_v56, 0.0  ;;  %v1702_v61 = vpack.c.bf16 %v1672_v62, %v1671_v58 }
 0x439   :  { %v1701_v59 = vpack.c.bf16 %v1670_v7, %v1669_v57 }
 0x43b   :  { %2715 = vmatprep.mubr.bf16.mxu0 %v1701_v59 }
 0x43c   :  { %2716 = vmatmul.mubr.bf16.vlgmr.msra.gmra.mxu0 %v1702_v61 }
 0x43e   :  { %v2673_v10 = vpop.f32.mrf.mxu0 }
 0x43f   :  { %v1567_v3 = vadd.f32 %v2673_v10, %v3450_v50 }
 0x440   :  { %v1558_v63 = vpop.f32.mrf.mxu0 }
 0x441   :  { %v1559_v1 = vadd.f32 %v3450_v50, %v1558_v63  ;;  %v1675_v60 = vmax.f32 %v1567_v3, 0.0 }
 0x442   :  { %v2674_v0 = vpop.f32.mrf.mxu0 }
 0x443   :  { %v1570_v2 = vadd.f32 %v2674_v0, %v3450_v50  ;;  %v1673_v8 = vmax.f32 %v1559_v1, 0.0 }
 0x444   :  { %v1561_v4 = vpop.f32.mrf.mxu0 }
 0x445   :  { %v1562_v5 = vadd.f32 %v3450_v50, %v1561_v4  ;;  %v1676_v6 = vmax.f32 %v1570_v2, 0.0 }
 0x447   :  { %v1674_v9 = vmax.f32 %v1562_v5, 0.0  ;;  %v1704_v12 = vpack.c.bf16 %v1676_v6, %v1675_v60 }
 0x449   :  { %v1703_v11 = vpack.c.bf16 %v1674_v9, %v1673_v8 }
 0x44b   :  { %2719 = vmatprep.mubr.bf16.mxu1 %v1703_v11 }
 0x44c   :  { %2720 = vmatmul.mubr.bf16.vlgmr.msra.gmra.mxu1 %v1704_v12 }
 0x44e   :  { %v2677_v13 = vpop.f32.mrf.mxu0 }
 0x44f   :  { %v1583_v18 = vadd.f32 %v2677_v13, %v3450_v50 }
 0x450   :  { %v1574_v14 = vpop.f32.mrf.mxu0 }
 0x451   :  { %v1575_v16 = vadd.f32 %v3450_v50, %v1574_v14  ;;  %v1679_v24 = vmax.f32 %v1583_v18, 0.0 }
 0x452   :  { %v2678_v15 = vpop.f32.mrf.mxu0 }
 0x453   :  { %v1586_v17 = vadd.f32 %v2678_v15, %v3450_v50  ;;  %v1677_v22 = vmax.f32 %v1575_v16, 0.0 }
 0x454   :  { %v1577_v19 = vpop.f32.mrf.mxu0 }
 0x455   :  { %v1578_v20 = vadd.f32 %v3450_v50, %v1577_v19  ;;  %v1680_v21 = vmax.f32 %v1586_v17, 0.0 }
 0x457   :  { %v1678_v23 = vmax.f32 %v1578_v20, 0.0  ;;  %v1706_v26 = vpack.c.bf16 %v1680_v21, %v1679_v24 }
 0x459   :  { %v1705_v25 = vpack.c.bf16 %v1678_v23, %v1677_v22 }
 0x45b   :  { %2723 = vmatprep.mubr.bf16.mxu1 %v1705_v25 }
 0x45c   :  { %2724 = vmatmul.mubr.bf16.gmra.mxu1 %v1706_v26 }
 0x45e   :  { %v2681_v27 = vpop.f32.mrf.mxu0 }
 0x45f   :  { %v1599_v32 = vadd.f32 %v2681_v27, %v3450_v50 }
 0x460   :  { %v1590_v28 = vpop.f32.mrf.mxu0 }
 0x461   :  { %v1591_v30 = vadd.f32 %v3450_v50, %v1590_v28  ;;  %v1683_v38 = vmax.f32 %v1599_v32, 0.0 }
 0x462   :  { %v2682_v29 = vpop.f32.mrf.mxu0 }
 0x463   :  { %v1602_v31 = vadd.f32 %v2682_v29, %v3450_v50  ;;  %v1681_v36 = vmax.f32 %v1591_v30, 0.0 }
 0x464   :  { %v1593_v33 = vpop.f32.mrf.mxu0 }
 0x465   :  { %v1594_v34 = vadd.f32 %v3450_v50, %v1593_v33  ;;  %v1684_v35 = vmax.f32 %v1602_v31, 0.0 }
 0x467   :  { %v1682_v37 = vmax.f32 %v1594_v34, 0.0  ;;  %v1708_v40 = vpack.c.bf16 %v1684_v35, %v1683_v38  ;;  %v3487_v35 = vld [vmem:[%s3539_s12] ss:$0 sm:$0xff]  ;;  %s2928_s12 = smov [#allocation8]  }
 0x468   :  { %s2114_s20 = sshll.u32 %s2928_s12, 4  ;;  %s2115_s20 = int_to_ptr.vmem [resolvable:$true] %s2114_s20 }
 0x469   :  { %v1707_v39 = vpack.c.bf16 %v1682_v37, %v1681_v36  ;;  %s2896_s21 = scalar_lea.vmem %s2115_s20, 2048  ;;  %p2901_p2 = scmp.lt.s32.totalorder %s2115_s20, %s2115_s20 }
 0x46a   :  { %p2897_p1 = scmp.ne.s32.totalorder %s2115_s20, %s2896_s21  ;;  %p2902_p3 = scmp.lt.s32.totalorder %s2896_s21, %s2896_s21 }
 0x46b   :  { %2727 = vmatprep.mubr.bf16.mxu1 %v1707_v39 }
 0x46c   :  { %2728 = vmatmul.mubr.bf16.gmra.mxu1 %v1708_v40  ;;  %p2903_p4 = por %p2902_p3, %p2901_p2 }
 0x46e   :  { %v2685_v41 = vpop.f32.mrf.mxu0  ;;  %p2904_p5 = pnand %p2903_p4, %p2897_p1 }
 0x46f   :  { %v1615_v46 = vadd.f32 %v2685_v41, %v3450_v50 }
 0x470   :  { %v1606_v42 = vpop.f32.mrf.mxu0 }
 0x471   :  { %v1607_v44 = vadd.f32 %v3450_v50, %v1606_v42  ;;  %v1687_v53 = vmax.f32 %v1615_v46, 0.0 }
 0x472   :  { %v2686_v43 = vpop.f32.mrf.mxu0 }
 0x473   :  { %v1618_v45 = vadd.f32 %v2686_v43, %v3450_v50  ;;  %v1685_v51 = vmax.f32 %v1607_v44, 0.0 }
 0x474   :  { %v1609_v47 = vpop.f32.mrf.mxu0 }
 0x475   :  { %v1610_v48 = vadd.f32 %v3450_v50, %v1609_v47  ;;  %v1688_v49 = vmax.f32 %v1618_v45, 0.0 }
 0x477   :  { %v1686_v52 = vmax.f32 %v1610_v48, 0.0  ;;  %v1710_v55 = vpack.c.bf16 %v1688_v49, %v1687_v53 }
 0x479   :  { %v1709_v54 = vpack.c.bf16 %v1686_v52, %v1685_v51 }
 0x47b   :  { %2731 = vmatprep.mubr.bf16.mxu1 %v1709_v54 }
 0x47c   :  { %2732 = vmatmul.mubr.bf16.gmra.mxu1 %v1710_v55 }
 0x47e   :  { %v2689_v56 = vpop.f32.mrf.mxu0 }
 0x47f   :  { %v1631_v59 = vadd.f32 %v2689_v56, %v3450_v50 }
 0x480   :  { %v1622_v62 = vpop.f32.mrf.mxu0 }
 0x481   :  { %v1623_v7 = vadd.f32 %v3450_v50, %v1622_v62  ;;  %v1691_v2 = vmax.f32 %v1631_v59, 0.0 }
 0x482   :  { %v2690_v57 = vpop.f32.mrf.mxu0 }
 0x483   :  { %v1634_v58 = vadd.f32 %v2690_v57, %v3450_v50  ;;  %v1689_v0 = vmax.f32 %v1623_v7, 0.0 }
 0x484   :  { %v1625_v61 = vpop.f32.mrf.mxu0 }
 0x485   :  { %v1626_v10 = vadd.f32 %v3450_v50, %v1625_v61  ;;  %v1692_v63 = vmax.f32 %v1634_v58, 0.0 }
 0x487   :  { %v1690_v1 = vmax.f32 %v1626_v10, 0.0  ;;  %v1712_v4 = vpack.c.bf16 %v1692_v63, %v1691_v2 }
 0x489   :  { %v1711_v3 = vpack.c.bf16 %v1690_v1, %v1689_v0 }
 0x48b   :  { %2735 = vmatprep.mubr.bf16.mxu1 %v1711_v3 }
 0x48c   :  { %2736 = vmatmul.mubr.bf16.gmra.mxu1 %v1712_v4 }
 0x48e   :  { %v2693_v5 = vpop.f32.mrf.mxu0 }
 0x48f   :  { %v1647_v11 = vadd.f32 %v2693_v5, %v3450_v50 }
 0x490   :  { %v1638_v6 = vpop.f32.mrf.mxu0 }
 0x491   :  { %v1639_v9 = vadd.f32 %v3450_v50, %v1638_v6  ;;  %v1695_v17 = vmax.f32 %v1647_v11, 0.0 }
 0x492   :  { %v2694_v8 = vpop.f32.mrf.mxu0 }
 0x493   :  { %v1650_v60 = vadd.f32 %v2694_v8, %v3450_v50  ;;  %v1693_v15 = vmax.f32 %v1639_v9, 0.0 }
 0x494   :  { %v1641_v12 = vpop.f32.mrf.mxu0 }
 0x495   :  { %v1642_v13 = vadd.f32 %v3450_v50, %v1641_v12  ;;  %v1696_v14 = vmax.f32 %v1650_v60, 0.0 }
 0x497   :  { %v1694_v16 = vmax.f32 %v1642_v13, 0.0  ;;  %v1714_v19 = vpack.c.bf16 %v1696_v14, %v1695_v17 }
 0x499   :  { %v1713_v18 = vpack.c.bf16 %v1694_v16, %v1693_v15 }
 0x49b   :  { %2739 = vmatprep.mubr.bf16.mxu1 %v1713_v18 }
 0x49c   :  { %2740 = vmatmul.mubr.bf16.gmra.mxu1 %v1714_v19 }
 0x49e   :  { %v2697_v20 = vpop.f32.mrf.mxu0 }
 0x49f   :  { %v1663_v25 = vadd.f32 %v2697_v20, %v3450_v50 }
 0x4a0   :  { %v1654_v21 = vpop.f32.mrf.mxu0 }
 0x4a1   :  { %v1655_v23 = vadd.f32 %v3450_v50, %v1654_v21  ;;  %v1699_v31 = vmax.f32 %v1663_v25, 0.0 }
 0x4a2   :  { %v2698_v22 = vpop.f32.mrf.mxu0 }
 0x4a3   :  { %v1666_v24 = vadd.f32 %v2698_v22, %v3450_v50  ;;  %v1697_v29 = vmax.f32 %v1655_v23, 0.0 }
 0x4a4   :  { %v1657_v26 = vpop.f32.mrf.mxu0 }
 0x4a5   :  { %v1658_v27 = vadd.f32 %v3450_v50, %v1657_v26  ;;  %v1700_v28 = vmax.f32 %v1666_v24, 0.0 }
 0x4a7   :  { %v1698_v30 = vmax.f32 %v1658_v27, 0.0  ;;  %v1716_v33 = vpack.c.bf16 %v1700_v28, %v1699_v31 }
 0x4a9   :  { %v1715_v32 = vpack.c.bf16 %v1698_v30, %v1697_v29 }
 0x4ab   :  { %2743 = vmatprep.mubr.bf16.mxu1 %v1715_v32 }
 0x4ac   :  { %2744 = vmatmul.mubr.bf16.gmra.mxu1 %v1716_v33 }
 0x4fc   :  { %v2717_v34 = vpop.f32.mrf.mxu0 }
 0x4fd   :  { %v1831_v38 = vadd.f32 %v2717_v34, %v3487_v35 }
 0x4fe   :  { %v1822_v36 = vpop.f32.mrf.mxu0 }
 0x4ff   :  { %v1823_v40 = vadd.f32 %v3487_v35, %v1822_v36 }
 0x500   :  { %v2718_v37 = vpop.f32.mrf.mxu0 }
 0x501   :  { %v1834_v50 = vadd.f32 %v2718_v37, %v3487_v35 }
 0x502   :  { %v1825_v39 = vpop.f32.mrf.mxu0 }
 0x503   :  { %v2278_v41 = vpack.c.bf16 %v1834_v50, %v1831_v38  ;;  %v1826_v42 = vadd.f32 %v3487_v35, %v1825_v39 }
 0x505   :  { %2350 = vst [vmem:[#allocation8 + $0x8] sm:$0xff] %v2278_v41   ;;  %v2273_v43 = vpack.c.bf16 %v1826_v42, %v1823_v40 }
 0x507   :  { %2274 = vst [vmem:[#allocation8] sm:$0xff] %v2273_v43  }
 0x50c   :  { %v2721_v44 = vpop.f32.mrf.mxu1 }
 0x50d   :  { %v1847_v47 = vadd.f32 %v2721_v44, %v3487_v35 }
 0x50e   :  { %v1838_v45 = vpop.f32.mrf.mxu1 }
 0x50f   :  { %v1839_v51 = vadd.f32 %v3487_v35, %v1838_v45 }
 0x510   :  { %v2722_v46 = vpop.f32.mrf.mxu1 }
 0x511   :  { %v1850_v48 = vadd.f32 %v2722_v46, %v3487_v35 }
 0x512   :  { %v1841_v49 = vpop.f32.mrf.mxu1 }
 0x513   :  { %v2288_v52 = vpack.c.bf16 %v1850_v48, %v1847_v47  ;;  %v1842_v53 = vadd.f32 %v3487_v35, %v1841_v49 }
 0x515   :  { %2352 = vst [vmem:[#allocation8 + $0x18] sm:$0xff] %v2288_v52   ;;  %v2283_v54 = vpack.c.bf16 %v1842_v53, %v1839_v51 }
 0x517   :  { %2351 = vst [vmem:[#allocation8 + $0x10] sm:$0xff] %v2283_v54  }
 0x51c   :  { %v2725_v55 = vpop.f32.mrf.mxu1 }
 0x51d   :  { %v1863_v57 = vadd.f32 %v2725_v55, %v3487_v35 }
 0x51e   :  { %v1854_v56 = vpop.f32.mrf.mxu1 }
 0x51f   :  { %v1855_v59 = vadd.f32 %v3487_v35, %v1854_v56 }
 0x520   :  { %v2726_v62 = vpop.f32.mrf.mxu1 }
 0x521   :  { %v1866_v7 = vadd.f32 %v2726_v62, %v3487_v35 }
 0x522   :  { %v1857_v58 = vpop.f32.mrf.mxu1 }
 0x523   :  { %v2298_v61 = vpack.c.bf16 %v1866_v7, %v1863_v57  ;;  %v1858_v10 = vadd.f32 %v3487_v35, %v1857_v58 }
 0x525   :  { %2354 = vst [vmem:[#allocation8 + $0x28] sm:$0xff] %v2298_v61   ;;  %v2293_v63 = vpack.c.bf16 %v1858_v10, %v1855_v59 }
 0x527   :  { %2353 = vst [vmem:[#allocation8 + $0x20] sm:$0xff] %v2293_v63  }
 0x52c   :  { %v2729_v0 = vpop.f32.mrf.mxu1 }
 0x52d   :  { %v1879_v3 = vadd.f32 %v2729_v0, %v3487_v35 }
 0x52e   :  { %v1870_v1 = vpop.f32.mrf.mxu1 }
 0x52f   :  { %v1871_v6 = vadd.f32 %v3487_v35, %v1870_v1 }
 0x530   :  { %v2730_v2 = vpop.f32.mrf.mxu1 }
 0x531   :  { %v1882_v4 = vadd.f32 %v2730_v2, %v3487_v35 }
 0x532   :  { %v1873_v5 = vpop.f32.mrf.mxu1 }
 0x533   :  { %v2308_v8 = vpack.c.bf16 %v1882_v4, %v1879_v3  ;;  %v1874_v9 = vadd.f32 %v3487_v35, %v1873_v5 }
 0x535   :  { %2356 = vst [vmem:[#allocation8 + $0x38] sm:$0xff] %v2308_v8   ;;  %v2303_v60 = vpack.c.bf16 %v1874_v9, %v1871_v6 }
 0x537   :  { %2355 = vst [vmem:[#allocation8 + $0x30] sm:$0xff] %v2303_v60  }
 0x53c   :  { %v2733_v11 = vpop.f32.mrf.mxu1 }
 0x53d   :  { %v1895_v14 = vadd.f32 %v2733_v11, %v3487_v35 }
 0x53e   :  { %v1886_v12 = vpop.f32.mrf.mxu1 }
 0x53f   :  { %v1887_v17 = vadd.f32 %v3487_v35, %v1886_v12 }
 0x540   :  { %v2734_v13 = vpop.f32.mrf.mxu1 }
 0x541   :  { %v1898_v15 = vadd.f32 %v2734_v13, %v3487_v35 }
 0x542   :  { %v1889_v16 = vpop.f32.mrf.mxu1 }
 0x543   :  { %v2318_v18 = vpack.c.bf16 %v1898_v15, %v1895_v14  ;;  %v1890_v19 = vadd.f32 %v3487_v35, %v1889_v16 }
 0x545   :  { %2358 = vst [vmem:[#allocation8 + $0x48] sm:$0xff] %v2318_v18   ;;  %v2313_v20 = vpack.c.bf16 %v1890_v19, %v1887_v17 }
 0x547   :  { %2357 = vst [vmem:[#allocation8 + $0x40] sm:$0xff] %v2313_v20  }
 0x54c   :  { %v2737_v21 = vpop.f32.mrf.mxu1 }
 0x54d   :  { %v1911_v24 = vadd.f32 %v2737_v21, %v3487_v35 }
 0x54e   :  { %v1902_v22 = vpop.f32.mrf.mxu1 }
 0x54f   :  { %v1903_v27 = vadd.f32 %v3487_v35, %v1902_v22 }
 0x550   :  { %v2738_v23 = vpop.f32.mrf.mxu1 }
 0x551   :  { %v1914_v25 = vadd.f32 %v2738_v23, %v3487_v35 }
 0x552   :  { %v1905_v26 = vpop.f32.mrf.mxu1 }
 0x553   :  { %v2328_v28 = vpack.c.bf16 %v1914_v25, %v1911_v24  ;;  %v1906_v29 = vadd.f32 %v3487_v35, %v1905_v26 }
 0x555   :  { %2360 = vst [vmem:[#allocation8 + $0x58] sm:$0xff] %v2328_v28   ;;  %v2323_v30 = vpack.c.bf16 %v1906_v29, %v1903_v27 }
 0x557   :  { %2359 = vst [vmem:[#allocation8 + $0x50] sm:$0xff] %v2323_v30  }
 0x55c   :  { %v2741_v31 = vpop.f32.mrf.mxu1 }
 0x55d   :  { %v1927_v34 = vadd.f32 %v2741_v31, %v3487_v35 }
 0x55e   :  { %v1918_v32 = vpop.f32.mrf.mxu1 }
 0x55f   :  { %v1919_v38 = vadd.f32 %v3487_v35, %v1918_v32 }
 0x560   :  { %v2742_v33 = vpop.f32.mrf.mxu1 }
 0x561   :  { %v1930_v36 = vadd.f32 %v2742_v33, %v3487_v35 }
 0x562   :  { %v1921_v37 = vpop.f32.mrf.mxu1 }
 0x563   :  { %v2338_v50 = vpack.c.bf16 %v1930_v36, %v1927_v34  ;;  %v1922_v39 = vadd.f32 %v3487_v35, %v1921_v37 }
 0x565   :  { %2362 = vst [vmem:[#allocation8 + $0x68] sm:$0xff] %v2338_v50   ;;  %v2333_v40 = vpack.c.bf16 %v1922_v39, %v1919_v38 }
 0x567   :  { %2361 = vst [vmem:[#allocation8 + $0x60] sm:$0xff] %v2333_v40  }
 0x56c   :  { %v2745_v41 = vpop.f32.mrf.mxu1 }
 0x56d   :  { %v1943_v44 = vadd.f32 %v2745_v41, %v3487_v35 }
 0x56e   :  { %v1934_v42 = vpop.f32.mrf.mxu1 }
 0x56f   :  { %v1935_v47 = vadd.f32 %v3487_v35, %v1934_v42 }
 0x570   :  { %v2746_v43 = vpop.f32.mrf.mxu1 }
 0x571   :  { %v1946_v45 = vadd.f32 %v2746_v43, %v3487_v35 }
 0x572   :  { %v1937_v46 = vpop.f32.mrf.mxu1 }
 0x573   :  { %v2348_v48 = vpack.c.bf16 %v1946_v45, %v1943_v44  ;;  %v1938_v49 = vadd.f32 %v3487_v35, %v1937_v46 }
 0x575   :  { %2364 = vst [vmem:[#allocation8 + $0x78] sm:$0xff] %v2348_v48   ;;  %v2343_v51 = vpack.c.bf16 %v1938_v49, %v1935_v47 }
 0x577   :  { %2363 = vst [vmem:[#allocation8 + $0x70] sm:$0xff] %v2343_v51  }
 0x578   :  { %2907 = shalt.err (!%p2904_p5)
}
 0x579   :  { %2120 = dma.vmem_to_hbm [thread:$0]  %s2115_s20, 2048, %s3540_s13, [#allocation4], %s2924_s30, %s2924_s30, %s2925_s14  }
 0x57a   :  { %2920 = dma.done.wait [#allocation4], 2048  }
 0x57b   :  { %2921 = vsyncadd [#allocation4], 4294965248 }
 0x57c   :  { %2124 = vsyncpa [#allocation3], 1 }
 0x57d   :  { %2125 = vsyncpa [#allocation6], 1 }
 0x57e   :  { %2126 = vsyncpa [#allocation4], 1 }

</bundles_post_ra>
